<compile_context>
chip_gen: v5e
topology: v5e:2x2
jax: 0.10.0
libtpu: 0.0.40
codegen_flags: <defaults>
</compile_context>

<pallas_src>
import functools
import numpy as np
import jax
import jax.numpy as jnp
from jax.experimental import pallas as pl
from jax.experimental.pallas import tpu as pltpu


def _round_up(x, m):
    return ((x + m - 1) // m) * m


def _make_lstm_kernel(num_layers, hidden, seq_len, batch_chunk, compute_dtype):
    L, H, T, Bc = num_layers, hidden, seq_len, batch_chunk
    G, GS = 4 * H, 3 * H
    n_w = 1 + 3 * (L - 1) + 2   # w_hh0, (w_in_l, w_hh_l, b_l)_{l>=1}, fc_w, fc_b

    def kernel(xp_ref, *rest):
        w_refs = rest[:n_w]
        out_ref = rest[n_w]
        hseq_ref = rest[n_w + 1]   # (T*Bc, H)  compute dtype : inter-layer h sequence
        proj_ref = rest[n_w + 2]   # (T*Bc, 4H) f32           : hoisted layer projection

        w_hh0_ref = w_refs[0]
        fc_w_ref, fc_b_ref = w_refs[-2], w_refs[-1]

        def recur(read_slab, w_hh_ref, store_seq):
            """Serial T-step recurrence for one layer.  Only the small
            (Bc,H)x(H,4H) h @ W_hh matmul lives inside the chain; the
            input-from-below contribution arrives pre-computed via read_slab."""
            c = jnp.zeros((Bc, H), jnp.float32)
            h_cd = None
            for t in range(T):                       # fully unrolled (T small)
                slab = read_slab(t)                  # (Bc, 4H) f32, lane-dense
                if t == 0:                           # h0 == 0 -> skip the dot
                    gates = slab
                else:
                    gates = slab + jnp.dot(h_cd, w_hh_ref[...],
                                           preferred_element_type=jnp.float32)
                # Gate columns pre-permuted to [i, f, o, g]: sigmoid over the
                # first contiguous 3H lanes, tanh only over the last H lanes
                # (half the EUP work of activating all 4H with both).
                sig = jax.nn.sigmoid(gates[:, :GS])
                g_g = jnp.tanh(gates[:, GS:])
                c = sig[:, H:2 * H] * c + sig[:, :H] * g_g
                h = sig[:, 2 * H:GS] * jnp.tanh(c)
                h_cd = h.astype(compute_dtype)
                if store_seq:
                    hseq_ref[pl.ds(t * Bc, Bc), :] = h_cd
            return h_cd

        # TODO(synk): for larger T, run the recurrence in time chunks via
        # lax.fori_loop(..., unroll=True) with h/c carried in VMEM scratch.
        # TODO(synk): pin W_hh in MXU weight registers across the unrolled
        # t-loop (pltpu.matmul_push_rhs / matmul_acc_lhs / matmul_pop) to drop
        # the T-1 redundant RHS pushes from the serial chain.

        # ---- Layer 0: input projection precomputed in the wrapper (xp). ----
        h_last = recur(lambda t: xp_ref[t], w_hh0_ref, store_seq=(L > 1))

        # ---- Layers 1..L-1, layer-major: one big hoisted projection GEMM ----
        # ---- over the full (T*Bc, H) h-sequence, then the serial t-loop. ----
        for l in range(1, L):
            w_in_ref = w_refs[1 + 3 * (l - 1)]
            w_hh_ref = w_refs[2 + 3 * (l - 1)]
            b_ref = w_refs[3 + 3 * (l - 1)]
            proj_ref[...] = (jnp.dot(hseq_ref[...], w_in_ref[...],
                                     preferred_element_type=jnp.float32)
                             + b_ref[...])
            h_last = recur(lambda t: proj_ref[pl.ds(t * Bc, Bc), :],
                           w_hh_ref, store_seq=(l < L - 1))

        # ---- FC head on the last timestep's hidden of the last layer. ----
        out_ref[...] = (jnp.dot(h_last, fc_w_ref[...],
                                preferred_element_type=jnp.float32)
                        + fc_b_ref[...])

    return kernel


def prepare_params(params, *, hidden, param_dtype=jnp.float32):
    """One-time weight repacking (outside the per-call hot path):
      * transpose to (in, 4H) layout and fuse b_ih + b_hh,
      * permute gate columns from PyTorch [i, f, g, o] to [i, f, o, g] so the
        kernel's sigmoid covers a contiguous 3H block and tanh only H,
      * pad the FC output dim to a lane-dense multiple of 128.
    Returned list layout:
      [w_in0 (I,4H), b0 (1,4H),                 # consumed by the wrapper (hoisted xp GEMM)
       w_hh0 (H,4H),                            # kernel
       (w_in_l (H,4H), w_hh_l (H,4H), b_l (1,4H)) for l = 1..L-1,
       fc_w (H,O_pad), fc_b (1,O_pad)]
    """
    H = hidden
    lstm = params["lstm"]
    L = len(lstm)

    def reorder(w):  # [..., 4H] columns: [i, f, g, o] -> [i, f, o, g]
        return jnp.concatenate(
            [w[..., :2 * H], w[..., 3 * H:4 * H], w[..., 2 * H:3 * H]], axis=-1)

    flat = []
    w_ih0, w_hh0, b_ih0, b_hh0 = lstm[0]
    flat.append(reorder(jnp.asarray(w_ih0.T, param_dtype)))                     # (I, 4H)
    flat.append(reorder(jnp.asarray((b_ih0 + b_hh0)[None, :], jnp.float32)))    # (1, 4H)
    flat.append(reorder(jnp.asarray(w_hh0.T, param_dtype)))                     # (H, 4H)

    for l in range(1, L):
        w_ih, w_hh, b_ih, b_hh = lstm[l]
        flat.append(reorder(jnp.asarray(w_ih.T, param_dtype)))                  # (H, 4H)
        flat.append(reorder(jnp.asarray(w_hh.T, param_dtype)))                  # (H, 4H)
        flat.append(reorder(jnp.asarray((b_ih + b_hh)[None, :], jnp.float32)))  # (1, 4H)

    # TODO(synk): on v7x, param_dtype could be fp8 (f32 accumulation) to halve
    # weight VMEM/DMA again vs bf16; not applicable on v5e/v6e MXUs.
    fc_w, fc_b = params["fc"]
    O = fc_w.shape[0]
    O_pad = _round_up(O, 128)
    fc_w_p = jnp.zeros((H, O_pad), param_dtype).at[:, :O].set(
        jnp.asarray(fc_w.T, param_dtype))                                       # (H, O_pad)
    fc_b_p = jnp.zeros((1, O_pad), jnp.float32).at[:, :O].set(
        jnp.asarray(fc_b, jnp.float32))                                         # (1, O_pad)
    flat.append(fc_w_p)
    flat.append(fc_b_p)
    return flat


def lstm_forward(x_btf, flat_params, *, num_layers, hidden, out_size,
                 batch_chunk=None):
    """x_btf: (B, T, I) float32, batch-first like the PyTorch module."""
    B, T, _ = x_btf.shape
    H = hidden
    G = 4 * H

    compute_dtype = flat_params[0].dtype
    w_in0, b0 = flat_params[0], flat_params[1]
    kernel_params = flat_params[2:]
    o_pad = kernel_params[-1].shape[-1]

    if batch_chunk is None:
        # One small chunk at toy batches (avoids padding waste); 128-row chunks
        # at realistic batches so the MXU sees M >= 128, grid overhead is
        # amortized, and num_chunks >= 2 lets the "parallel" axis shard across
        # both TensorCores on v7x.
        batch_chunk = min(128, _round_up(B, 8))
    batch_chunk = _round_up(batch_chunk, 8)
    B_pad = _round_up(B, batch_chunk)
    num_chunks = B_pad // batch_chunk

    # Layer-0 input projection hoisted out of the kernel entirely (x has only a
    # lane-sparse I features): one plain XLA GEMM producing a lane-dense
    # time-major (T, B, 4H) slab.  Cast x to the compute dtype first so the
    # GEMM operands / DMA are bf16 when the weights are bf16.
    x_cd = x_btf.astype(compute_dtype)
    xp = jnp.einsum("bti,ig->btg", x_cd, w_in0,
                    preferred_element_type=jnp.float32) + b0                    # (B, T, 4H) f32
    xp = jnp.transpose(xp, (1, 0, 2))                                           # (T, B, 4H)
    if B_pad != B:
        xp = jnp.pad(xp, ((0, 0), (0, B_pad - B), (0, 0)))

    kernel = _make_lstm_kernel(num_layers, hidden, T, batch_chunk, compute_dtype)

    in_specs = [pl.BlockSpec((T, batch_chunk, G), lambda j: (0, j, 0))]
    # Weights/biases: constant index_map across the grid (whole-array blocks).
    # TODO(synk): at realistic H/L, stream one layer's weights at a time (layer
    # grid axis or manual make_async_copy double-buffer) and/or single-buffer
    # these constant blocks (pl.Buffered(1)) to fit v7x's 64 MiB VMEM.
    in_specs += [pl.BlockSpec(w.shape, lambda j: (0, 0)) for w in kernel_params]
    out_spec = pl.BlockSpec((batch_chunk, o_pad), lambda j: (j, 0))

    out_pad = pl.pallas_call(
        kernel,
        out_shape=jax.ShapeDtypeStruct((B_pad, o_pad), jnp.float32),
        grid=(num_chunks,),
        in_specs=in_specs,
        out_specs=out_spec,
        scratch_shapes=[
            pltpu.VMEM((T * batch_chunk, H), compute_dtype),   # inter-layer h sequence
            pltpu.VMEM((T * batch_chunk, G), jnp.float32),     # hoisted layer projection
        ],
        compiler_params=pltpu.CompilerParams(
            dimension_semantics=("parallel",),      # batch chunks -> both TCs on v7x
            vmem_limit_bytes=32 * 1024 * 1024),     # raise v5e's 16 MiB scoped default
    )(xp, *kernel_params)

    return out_pad[:B, :out_size]


def lstm_reference(x_btf, params, *, num_layers, hidden, out_size):
    """Pure-JAX reference matching torch.nn.LSTM(batch_first=True) + Linear."""
    B, T, _ = x_btf.shape
    hs = [jnp.zeros((B, hidden), jnp.float32) for _ in range(num_layers)]
    cs = [jnp.zeros((B, hidden), jnp.float32) for _ in range(num_layers)]
    for t in range(T):
        inp = x_btf[:, t, :]
        for l in range(num_layers):
            w_ih, w_hh, b_ih, b_hh = params["lstm"][l]
            gates = inp @ w_ih.T + b_ih + hs[l] @ w_hh.T + b_hh
            i_g = jax.nn.sigmoid(gates[:, 0 * hidden:1 * hidden])
            f_g = jax.nn.sigmoid(gates[:, 1 * hidden:2 * hidden])
            g_g = jnp.tanh(gates[:, 2 * hidden:3 * hidden])
            o_g = jax.nn.sigmoid(gates[:, 3 * hidden:4 * hidden])
            cs[l] = f_g * cs[l] + i_g * g_g
            hs[l] = o_g * jnp.tanh(cs[l])
            inp = hs[l]
    fc_w, fc_b = params["fc"]
    return hs[-1] @ fc_w.T + fc_b


def init_params(key, *, input_size, hidden, num_layers, out_size):
    """Deterministic init mirroring PyTorch shapes (uniform +-1/sqrt(H))."""
    bound = 1.0 / np.sqrt(hidden)
    params = {"lstm": [], "fc": None}
    for l in range(num_layers):
        in_l = input_size if l == 0 else hidden
        key, k1, k2, k3, k4 = jax.random.split(key, 5)
        w_ih = jax.random.uniform(k1, (4 * hidden, in_l), jnp.float32, -bound, bound)
        w_hh = jax.random.uniform(k2, (4 * hidden, hidden), jnp.float32, -bound, bound)
        b_ih = jax.random.uniform(k3, (4 * hidden,), jnp.float32, -bound, bound)
        b_hh = jax.random.uniform(k4, (4 * hidden,), jnp.float32, -bound, bound)
        params["lstm"].append((w_ih, w_hh, b_ih, b_hh))
    key, k5, k6 = jax.random.split(key, 3)
    fc_w = jax.random.uniform(k5, (out_size, hidden), jnp.float32, -bound, bound)
    fc_b = jax.random.uniform(k6, (out_size,), jnp.float32, -bound, bound)
    params["fc"] = (fc_w, fc_b)
    return params


if __name__ == "__main__":
    # Small shapes consistent with the module's forward:
    #   X: (batch=2, seq=8, input_size=4), hidden=32, layers=2, output=3
    B, T, I, H, L, O = 2, 8, 4, 32, 2, 3

    root = jax.random.PRNGKey(0)
    kx, kp = jax.random.split(root)
    x = jax.random.normal(kx, (B, T, I), jnp.float32)
    params = init_params(kp, input_size=I, hidden=H, num_layers=L, out_size=O)
    ref = lstm_reference(x, params, num_layers=L, hidden=H, out_size=O)

    run = jax.jit(functools.partial(
        lstm_forward, num_layers=L, hidden=H, out_size=O))

    # f32 weights: tight match against the pure-JAX reference.
    flat_f32 = prepare_params(params, hidden=H, param_dtype=jnp.float32)
    out_f32 = jax.block_until_ready(run(x, flat_f32))
    assert out_f32.shape == (B, O)
    np.testing.assert_allclose(np.asarray(out_f32), np.asarray(ref),
                               rtol=1e-4, atol=1e-5)

    # bf16 weights / matmul operands (v6e/v7x MXU-native), f32 accumulation and
    # f32 gate/state math.
    flat_bf16 = prepare_params(params, hidden=H, param_dtype=jnp.bfloat16)
    out_bf16 = jax.block_until_ready(run(x, flat_bf16))
    np.testing.assert_allclose(np.asarray(out_bf16), np.asarray(ref),
                               rtol=5e-2, atol=5e-2)

    print("KERNEL_OK")
</pallas_src>

<mosaic_0001>
module attributes {stable_mosaic.version = 11 : i64} {
  func.func @kernel(%arg0: i32, %arg1: memref<8x8x128xf32, #tpu.memory_space<vmem>>, %arg2: memref<32x128xf32, #tpu.memory_space<vmem>>, %arg3: memref<32x128xf32, #tpu.memory_space<vmem>>, %arg4: memref<32x128xf32, #tpu.memory_space<vmem>>, %arg5: memref<1x128xf32, #tpu.memory_space<vmem>>, %arg6: memref<32x128xf32, #tpu.memory_space<vmem>>, %arg7: memref<1x128xf32, #tpu.memory_space<vmem>>, %arg8: memref<8x128xf32, #tpu.memory_space<vmem>>, %arg9: memref<64x32xf32, #tpu.memory_space<vmem>>, %arg10: memref<64x128xf32, #tpu.memory_space<vmem>>) attributes {dimension_semantics = [#tpu.dimension_semantics<parallel>], iteration_bounds = array<i64: 1>, scalar_prefetch = 0 : i64, scratch_operands = 2 : i64, tpu.core_type = #tpu.core_type<tc>, window_params = [{transform_indices = @transform_0, window_bounds = array<i64: 8, 8, 128>}, {pipeline_mode = #tpu.pipeline_mode<synchronous>, transform_indices = @transform_1, window_bounds = array<i64: 32, 128>}, {pipeline_mode = #tpu.pipeline_mode<synchronous>, transform_indices = @transform_2, window_bounds = array<i64: 32, 128>}, {pipeline_mode = #tpu.pipeline_mode<synchronous>, transform_indices = @transform_3, window_bounds = array<i64: 32, 128>}, {pipeline_mode = #tpu.pipeline_mode<synchronous>, transform_indices = @transform_4, window_bounds = array<i64: 1, 128>}, {pipeline_mode = #tpu.pipeline_mode<synchronous>, transform_indices = @transform_5, window_bounds = array<i64: 32, 128>}, {pipeline_mode = #tpu.pipeline_mode<synchronous>, transform_indices = @transform_6, window_bounds = array<i64: 1, 128>}, {transform_indices = @transform_7, window_bounds = array<i64: 8, 128>}]} {
    %cst = arith.constant 0.000000e+00 : f32
    %0 = vector.broadcast %cst : f32 to vector<8x32xf32>
    %c0 = arith.constant 0 : index
    %c0_0 = arith.constant 0 : index
    %c0_1 = arith.constant 0 : index
    %1 = vector.load %arg1[%c0, %c0_0, %c0_1] : memref<8x8x128xf32, #tpu.memory_space<vmem>>, vector<1x8x128xf32>
    %2 = vector.shape_cast %1 : vector<1x8x128xf32> to vector<8x128xf32>
    %3 = vector.extract_strided_slice %2 {offsets = [0, 0], sizes = [8, 96], strides = [1, 1]} : vector<8x128xf32> to vector<8x96xf32>
    %4 = arith.negf %3 : vector<8x96xf32>
    %5 = math.exp %4 : vector<8x96xf32>
    %cst_2 = arith.constant 1.000000e+00 : f32
    %6 = vector.broadcast %cst_2 : f32 to vector<8x96xf32>
    %7 = arith.addf %6, %5 : vector<8x96xf32>
    %8 = arith.divf %6, %7 : vector<8x96xf32>
    %9 = vector.extract_strided_slice %2 {offsets = [0, 96], sizes = [8, 32], strides = [1, 1]} : vector<8x128xf32> to vector<8x32xf32>
    %10 = math.tanh %9 : vector<8x32xf32>
    %11 = vector.extract_strided_slice %8 {offsets = [0, 32], sizes = [8, 32], strides = [1, 1]} : vector<8x96xf32> to vector<8x32xf32>
    %12 = arith.mulf %11, %0 : vector<8x32xf32>
    %13 = vector.extract_strided_slice %8 {offsets = [0, 0], sizes = [8, 32], strides = [1, 1]} : vector<8x96xf32> to vector<8x32xf32>
    %14 = arith.mulf %13, %10 : vector<8x32xf32>
    %15 = arith.addf %12, %14 : vector<8x32xf32>
    %16 = vector.extract_strided_slice %8 {offsets = [0, 64], sizes = [8, 32], strides = [1, 1]} : vector<8x96xf32> to vector<8x32xf32>
    %17 = math.tanh %15 : vector<8x32xf32>
    %18 = arith.mulf %16, %17 : vector<8x32xf32>
    %c0_3 = arith.constant 0 : index
    %c0_4 = arith.constant 0 : index
    %19 = vector.load %arg9[%c0_3, %c0_4] : memref<64x32xf32, #tpu.memory_space<vmem>>, vector<8x32xf32>
    tpu.vector_store %arg9[%c0_3, %c0_4], %18 {strides = array<i32>} : memref<64x32xf32, #tpu.memory_space<vmem>>, vector<8x32xf32>,
    %c1 = arith.constant 1 : index
    %c0_5 = arith.constant 0 : index
    %c0_6 = arith.constant 0 : index
    %20 = vector.load %arg1[%c1, %c0_5, %c0_6] : memref<8x8x128xf32, #tpu.memory_space<vmem>>, vector<1x8x128xf32>
    %21 = vector.shape_cast %20 : vector<1x8x128xf32> to vector<8x128xf32>
    %c0_7 = arith.constant 0 : index
    %c0_8 = arith.constant 0 : index
    %22 = vector.load %arg2[%c0_7, %c0_8] : memref<32x128xf32, #tpu.memory_space<vmem>>, vector<32x128xf32>
    %cst_9 = arith.constant dense<0.000000e+00> : vector<8x128xf32>
    %23 = tpu.matmul %18, %22, %cst_9 {dimension_numbers = #tpu.dot_dimension_numbers<[1], [0], [0], [1], [0, 0, 1, 1], [], []>} : vector<8x32xf32>, vector<32x128xf32>, vector<8x128xf32> -> vector<8x128xf32>
    %24 = arith.addf %21, %23 : vector<8x128xf32>
    %25 = vector.extract_strided_slice %24 {offsets = [0, 0], sizes = [8, 96], strides = [1, 1]} : vector<8x128xf32> to vector<8x96xf32>
    %26 = arith.negf %25 : vector<8x96xf32>
    %27 = math.exp %26 : vector<8x96xf32>
    %cst_10 = arith.constant 1.000000e+00 : f32
    %28 = vector.broadcast %cst_10 : f32 to vector<8x96xf32>
    %29 = arith.addf %28, %27 : vector<8x96xf32>
    %30 = arith.divf %28, %29 : vector<8x96xf32>
    %31 = vector.extract_strided_slice %24 {offsets = [0, 96], sizes = [8, 32], strides = [1, 1]} : vector<8x128xf32> to vector<8x32xf32>
    %32 = math.tanh %31 : vector<8x32xf32>
    %33 = vector.extract_strided_slice %30 {offsets = [0, 32], sizes = [8, 32], strides = [1, 1]} : vector<8x96xf32> to vector<8x32xf32>
    %34 = arith.mulf %33, %15 : vector<8x32xf32>
    %35 = vector.extract_strided_slice %30 {offsets = [0, 0], sizes = [8, 32], strides = [1, 1]} : vector<8x96xf32> to vector<8x32xf32>
    %36 = arith.mulf %35, %32 : vector<8x32xf32>
    %37 = arith.addf %34, %36 : vector<8x32xf32>
    %38 = vector.extract_strided_slice %30 {offsets = [0, 64], sizes = [8, 32], strides = [1, 1]} : vector<8x96xf32> to vector<8x32xf32>
    %39 = math.tanh %37 : vector<8x32xf32>
    %40 = arith.mulf %38, %39 : vector<8x32xf32>
    %c8 = arith.constant 8 : index
    %c0_11 = arith.constant 0 : index
    %41 = vector.load %arg9[%c8, %c0_11] : memref<64x32xf32, #tpu.memory_space<vmem>>, vector<8x32xf32>
    tpu.vector_store %arg9[%c8, %c0_11], %40 {strides = array<i32>} : memref<64x32xf32, #tpu.memory_space<vmem>>, vector<8x32xf32>,
    %c2 = arith.constant 2 : index
    %c0_12 = arith.constant 0 : index
    %c0_13 = arith.constant 0 : index
    %42 = vector.load %arg1[%c2, %c0_12, %c0_13] : memref<8x8x128xf32, #tpu.memory_space<vmem>>, vector<1x8x128xf32>
    %43 = vector.shape_cast %42 : vector<1x8x128xf32> to vector<8x128xf32>
    %c0_14 = arith.constant 0 : index
    %c0_15 = arith.constant 0 : index
    %44 = vector.load %arg2[%c0_14, %c0_15] : memref<32x128xf32, #tpu.memory_space<vmem>>, vector<32x128xf32>
    %cst_16 = arith.constant dense<0.000000e+00> : vector<8x128xf32>
    %45 = tpu.matmul %40, %44, %cst_16 {dimension_numbers = #tpu.dot_dimension_numbers<[1], [0], [0], [1], [0, 0, 1, 1], [], []>} : vector<8x32xf32>, vector<32x128xf32>, vector<8x128xf32> -> vector<8x128xf32>
    %46 = arith.addf %43, %45 : vector<8x128xf32>
    %47 = vector.extract_strided_slice %46 {offsets = [0, 0], sizes = [8, 96], strides = [1, 1]} : vector<8x128xf32> to vector<8x96xf32>
    %48 = arith.negf %47 : vector<8x96xf32>
    %49 = math.exp %48 : vector<8x96xf32>
    %cst_17 = arith.constant 1.000000e+00 : f32
    %50 = vector.broadcast %cst_17 : f32 to vector<8x96xf32>
    %51 = arith.addf %50, %49 : vector<8x96xf32>
    %52 = arith.divf %50, %51 : vector<8x96xf32>
    %53 = vector.extract_strided_slice %46 {offsets = [0, 96], sizes = [8, 32], strides = [1, 1]} : vector<8x128xf32> to vector<8x32xf32>
    %54 = math.tanh %53 : vector<8x32xf32>
    %55 = vector.extract_strided_slice %52 {offsets = [0, 32], sizes = [8, 32], strides = [1, 1]} : vector<8x96xf32> to vector<8x32xf32>
    %56 = arith.mulf %55, %37 : vector<8x32xf32>
    %57 = vector.extract_strided_slice %52 {offsets = [0, 0], sizes = [8, 32], strides = [1, 1]} : vector<8x96xf32> to vector<8x32xf32>
    %58 = arith.mulf %57, %54 : vector<8x32xf32>
    %59 = arith.addf %56, %58 : vector<8x32xf32>
    %60 = vector.extract_strided_slice %52 {offsets = [0, 64], sizes = [8, 32], strides = [1, 1]} : vector<8x96xf32> to vector<8x32xf32>
    %61 = math.tanh %59 : vector<8x32xf32>
    %62 = arith.mulf %60, %61 : vector<8x32xf32>
    %c16 = arith.constant 16 : index
    %c0_18 = arith.constant 0 : index
    %63 = vector.load %arg9[%c16, %c0_18] : memref<64x32xf32, #tpu.memory_space<vmem>>, vector<8x32xf32>
    tpu.vector_store %arg9[%c16, %c0_18], %62 {strides = array<i32>} : memref<64x32xf32, #tpu.memory_space<vmem>>, vector<8x32xf32>,
    %c3 = arith.constant 3 : index
    %c0_19 = arith.constant 0 : index
    %c0_20 = arith.constant 0 : index
    %64 = vector.load %arg1[%c3, %c0_19, %c0_20] : memref<8x8x128xf32, #tpu.memory_space<vmem>>, vector<1x8x128xf32>
    %65 = vector.shape_cast %64 : vector<1x8x128xf32> to vector<8x128xf32>
    %c0_21 = arith.constant 0 : index
    %c0_22 = arith.constant 0 : index
    %66 = vector.load %arg2[%c0_21, %c0_22] : memref<32x128xf32, #tpu.memory_space<vmem>>, vector<32x128xf32>
    %cst_23 = arith.constant dense<0.000000e+00> : vector<8x128xf32>
    %67 = tpu.matmul %62, %66, %cst_23 {dimension_numbers = #tpu.dot_dimension_numbers<[1], [0], [0], [1], [0, 0, 1, 1], [], []>} : vector<8x32xf32>, vector<32x128xf32>, vector<8x128xf32> -> vector<8x128xf32>
    %68 = arith.addf %65, %67 : vector<8x128xf32>
    %69 = vector.extract_strided_slice %68 {offsets = [0, 0], sizes = [8, 96], strides = [1, 1]} : vector<8x128xf32> to vector<8x96xf32>
    %70 = arith.negf %69 : vector<8x96xf32>
    %71 = math.exp %70 : vector<8x96xf32>
    %cst_24 = arith.constant 1.000000e+00 : f32
    %72 = vector.broadcast %cst_24 : f32 to vector<8x96xf32>
    %73 = arith.addf %72, %71 : vector<8x96xf32>
    %74 = arith.divf %72, %73 : vector<8x96xf32>
    %75 = vector.extract_strided_slice %68 {offsets = [0, 96], sizes = [8, 32], strides = [1, 1]} : vector<8x128xf32> to vector<8x32xf32>
    %76 = math.tanh %75 : vector<8x32xf32>
    %77 = vector.extract_strided_slice %74 {offsets = [0, 32], sizes = [8, 32], strides = [1, 1]} : vector<8x96xf32> to vector<8x32xf32>
    %78 = arith.mulf %77, %59 : vector<8x32xf32>
    %79 = vector.extract_strided_slice %74 {offsets = [0, 0], sizes = [8, 32], strides = [1, 1]} : vector<8x96xf32> to vector<8x32xf32>
    %80 = arith.mulf %79, %76 : vector<8x32xf32>
    %81 = arith.addf %78, %80 : vector<8x32xf32>
    %82 = vector.extract_strided_slice %74 {offsets = [0, 64], sizes = [8, 32], strides = [1, 1]} : vector<8x96xf32> to vector<8x32xf32>
    %83 = math.tanh %81 : vector<8x32xf32>
    %84 = arith.mulf %82, %83 : vector<8x32xf32>
    %c24 = arith.constant 24 : index
    %c0_25 = arith.constant 0 : index
    %85 = vector.load %arg9[%c24, %c0_25] : memref<64x32xf32, #tpu.memory_space<vmem>>, vector<8x32xf32>
    tpu.vector_store %arg9[%c24, %c0_25], %84 {strides = array<i32>} : memref<64x32xf32, #tpu.memory_space<vmem>>, vector<8x32xf32>,
    %c4 = arith.constant 4 : index
    %c0_26 = arith.constant 0 : index
    %c0_27 = arith.constant 0 : index
    %86 = vector.load %arg1[%c4, %c0_26, %c0_27] : memref<8x8x128xf32, #tpu.memory_space<vmem>>, vector<1x8x128xf32>
    %87 = vector.shape_cast %86 : vector<1x8x128xf32> to vector<8x128xf32>
    %c0_28 = arith.constant 0 : index
    %c0_29 = arith.constant 0 : index
    %88 = vector.load %arg2[%c0_28, %c0_29] : memref<32x128xf32, #tpu.memory_space<vmem>>, vector<32x128xf32>
    %cst_30 = arith.constant dense<0.000000e+00> : vector<8x128xf32>
    %89 = tpu.matmul %84, %88, %cst_30 {dimension_numbers = #tpu.dot_dimension_numbers<[1], [0], [0], [1], [0, 0, 1, 1], [], []>} : vector<8x32xf32>, vector<32x128xf32>, vector<8x128xf32> -> vector<8x128xf32>
    %90 = arith.addf %87, %89 : vector<8x128xf32>
    %91 = vector.extract_strided_slice %90 {offsets = [0, 0], sizes = [8, 96], strides = [1, 1]} : vector<8x128xf32> to vector<8x96xf32>
    %92 = arith.negf %91 : vector<8x96xf32>
    %93 = math.exp %92 : vector<8x96xf32>
    %cst_31 = arith.constant 1.000000e+00 : f32
    %94 = vector.broadcast %cst_31 : f32 to vector<8x96xf32>
    %95 = arith.addf %94, %93 : vector<8x96xf32>
    %96 = arith.divf %94, %95 : vector<8x96xf32>
    %97 = vector.extract_strided_slice %90 {offsets = [0, 96], sizes = [8, 32], strides = [1, 1]} : vector<8x128xf32> to vector<8x32xf32>
    %98 = math.tanh %97 : vector<8x32xf32>
    %99 = vector.extract_strided_slice %96 {offsets = [0, 32], sizes = [8, 32], strides = [1, 1]} : vector<8x96xf32> to vector<8x32xf32>
    %100 = arith.mulf %99, %81 : vector<8x32xf32>
    %101 = vector.extract_strided_slice %96 {offsets = [0, 0], sizes = [8, 32], strides = [1, 1]} : vector<8x96xf32> to vector<8x32xf32>
    %102 = arith.mulf %101, %98 : vector<8x32xf32>
    %103 = arith.addf %100, %102 : vector<8x32xf32>
    %104 = vector.extract_strided_slice %96 {offsets = [0, 64], sizes = [8, 32], strides = [1, 1]} : vector<8x96xf32> to vector<8x32xf32>
    %105 = math.tanh %103 : vector<8x32xf32>
    %106 = arith.mulf %104, %105 : vector<8x32xf32>
    %c32 = arith.constant 32 : index
    %c0_32 = arith.constant 0 : index
    %107 = vector.load %arg9[%c32, %c0_32] : memref<64x32xf32, #tpu.memory_space<vmem>>, vector<8x32xf32>
    tpu.vector_store %arg9[%c32, %c0_32], %106 {strides = array<i32>} : memref<64x32xf32, #tpu.memory_space<vmem>>, vector<8x32xf32>,
    %c5 = arith.constant 5 : index
    %c0_33 = arith.constant 0 : index
    %c0_34 = arith.constant 0 : index
    %108 = vector.load %arg1[%c5, %c0_33, %c0_34] : memref<8x8x128xf32, #tpu.memory_space<vmem>>, vector<1x8x128xf32>
    %109 = vector.shape_cast %108 : vector<1x8x128xf32> to vector<8x128xf32>
    %c0_35 = arith.constant 0 : index
    %c0_36 = arith.constant 0 : index
    %110 = vector.load %arg2[%c0_35, %c0_36] : memref<32x128xf32, #tpu.memory_space<vmem>>, vector<32x128xf32>
    %cst_37 = arith.constant dense<0.000000e+00> : vector<8x128xf32>
    %111 = tpu.matmul %106, %110, %cst_37 {dimension_numbers = #tpu.dot_dimension_numbers<[1], [0], [0], [1], [0, 0, 1, 1], [], []>} : vector<8x32xf32>, vector<32x128xf32>, vector<8x128xf32> -> vector<8x128xf32>
    %112 = arith.addf %109, %111 : vector<8x128xf32>
    %113 = vector.extract_strided_slice %112 {offsets = [0, 0], sizes = [8, 96], strides = [1, 1]} : vector<8x128xf32> to vector<8x96xf32>
    %114 = arith.negf %113 : vector<8x96xf32>
    %115 = math.exp %114 : vector<8x96xf32>
    %cst_38 = arith.constant 1.000000e+00 : f32
    %116 = vector.broadcast %cst_38 : f32 to vector<8x96xf32>
    %117 = arith.addf %116, %115 : vector<8x96xf32>
    %118 = arith.divf %116, %117 : vector<8x96xf32>
    %119 = vector.extract_strided_slice %112 {offsets = [0, 96], sizes = [8, 32], strides = [1, 1]} : vector<8x128xf32> to vector<8x32xf32>
    %120 = math.tanh %119 : vector<8x32xf32>
    %121 = vector.extract_strided_slice %118 {offsets = [0, 32], sizes = [8, 32], strides = [1, 1]} : vector<8x96xf32> to vector<8x32xf32>
    %122 = arith.mulf %121, %103 : vector<8x32xf32>
    %123 = vector.extract_strided_slice %118 {offsets = [0, 0], sizes = [8, 32], strides = [1, 1]} : vector<8x96xf32> to vector<8x32xf32>
    %124 = arith.mulf %123, %120 : vector<8x32xf32>
    %125 = arith.addf %122, %124 : vector<8x32xf32>
    %126 = vector.extract_strided_slice %118 {offsets = [0, 64], sizes = [8, 32], strides = [1, 1]} : vector<8x96xf32> to vector<8x32xf32>
    %127 = math.tanh %125 : vector<8x32xf32>
    %128 = arith.mulf %126, %127 : vector<8x32xf32>
    %c40 = arith.constant 40 : index
    %c0_39 = arith.constant 0 : index
    %129 = vector.load %arg9[%c40, %c0_39] : memref<64x32xf32, #tpu.memory_space<vmem>>, vector<8x32xf32>
    tpu.vector_store %arg9[%c40, %c0_39], %128 {strides = array<i32>} : memref<64x32xf32, #tpu.memory_space<vmem>>, vector<8x32xf32>,
    %c6 = arith.constant 6 : index
    %c0_40 = arith.constant 0 : index
    %c0_41 = arith.constant 0 : index
    %130 = vector.load %arg1[%c6, %c0_40, %c0_41] : memref<8x8x128xf32, #tpu.memory_space<vmem>>, vector<1x8x128xf32>
    %131 = vector.shape_cast %130 : vector<1x8x128xf32> to vector<8x128xf32>
    %c0_42 = arith.constant 0 : index
    %c0_43 = arith.constant 0 : index
    %132 = vector.load %arg2[%c0_42, %c0_43] : memref<32x128xf32, #tpu.memory_space<vmem>>, vector<32x128xf32>
    %cst_44 = arith.constant dense<0.000000e+00> : vector<8x128xf32>
    %133 = tpu.matmul %128, %132, %cst_44 {dimension_numbers = #tpu.dot_dimension_numbers<[1], [0], [0], [1], [0, 0, 1, 1], [], []>} : vector<8x32xf32>, vector<32x128xf32>, vector<8x128xf32> -> vector<8x128xf32>
    %134 = arith.addf %131, %133 : vector<8x128xf32>
    %135 = vector.extract_strided_slice %134 {offsets = [0, 0], sizes = [8, 96], strides = [1, 1]} : vector<8x128xf32> to vector<8x96xf32>
    %136 = arith.negf %135 : vector<8x96xf32>
    %137 = math.exp %136 : vector<8x96xf32>
    %cst_45 = arith.constant 1.000000e+00 : f32
    %138 = vector.broadcast %cst_45 : f32 to vector<8x96xf32>
    %139 = arith.addf %138, %137 : vector<8x96xf32>
    %140 = arith.divf %138, %139 : vector<8x96xf32>
    %141 = vector.extract_strided_slice %134 {offsets = [0, 96], sizes = [8, 32], strides = [1, 1]} : vector<8x128xf32> to vector<8x32xf32>
    %142 = math.tanh %141 : vector<8x32xf32>
    %143 = vector.extract_strided_slice %140 {offsets = [0, 32], sizes = [8, 32], strides = [1, 1]} : vector<8x96xf32> to vector<8x32xf32>
    %144 = arith.mulf %143, %125 : vector<8x32xf32>
    %145 = vector.extract_strided_slice %140 {offsets = [0, 0], sizes = [8, 32], strides = [1, 1]} : vector<8x96xf32> to vector<8x32xf32>
    %146 = arith.mulf %145, %142 : vector<8x32xf32>
    %147 = arith.addf %144, %146 : vector<8x32xf32>
    %148 = vector.extract_strided_slice %140 {offsets = [0, 64], sizes = [8, 32], strides = [1, 1]} : vector<8x96xf32> to vector<8x32xf32>
    %149 = math.tanh %147 : vector<8x32xf32>
    %150 = arith.mulf %148, %149 : vector<8x32xf32>
    %c48 = arith.constant 48 : index
    %c0_46 = arith.constant 0 : index
    %151 = vector.load %arg9[%c48, %c0_46] : memref<64x32xf32, #tpu.memory_space<vmem>>, vector<8x32xf32>
    tpu.vector_store %arg9[%c48, %c0_46], %150 {strides = array<i32>} : memref<64x32xf32, #tpu.memory_space<vmem>>, vector<8x32xf32>,
    %c7 = arith.constant 7 : index
    %c0_47 = arith.constant 0 : index
    %c0_48 = arith.constant 0 : index
    %152 = vector.load %arg1[%c7, %c0_47, %c0_48] : memref<8x8x128xf32, #tpu.memory_space<vmem>>, vector<1x8x128xf32>
    %153 = vector.shape_cast %152 : vector<1x8x128xf32> to vector<8x128xf32>
    %c0_49 = arith.constant 0 : index
    %c0_50 = arith.constant 0 : index
    %154 = vector.load %arg2[%c0_49, %c0_50] : memref<32x128xf32, #tpu.memory_space<vmem>>, vector<32x128xf32>
    %cst_51 = arith.constant dense<0.000000e+00> : vector<8x128xf32>
    %155 = tpu.matmul %150, %154, %cst_51 {dimension_numbers = #tpu.dot_dimension_numbers<[1], [0], [0], [1], [0, 0, 1, 1], [], []>} : vector<8x32xf32>, vector<32x128xf32>, vector<8x128xf32> -> vector<8x128xf32>
    %156 = arith.addf %153, %155 : vector<8x128xf32>
    %157 = vector.extract_strided_slice %156 {offsets = [0, 0], sizes = [8, 96], strides = [1, 1]} : vector<8x128xf32> to vector<8x96xf32>
    %158 = arith.negf %157 : vector<8x96xf32>
    %159 = math.exp %158 : vector<8x96xf32>
    %cst_52 = arith.constant 1.000000e+00 : f32
    %160 = vector.broadcast %cst_52 : f32 to vector<8x96xf32>
    %161 = arith.addf %160, %159 : vector<8x96xf32>
    %162 = arith.divf %160, %161 : vector<8x96xf32>
    %163 = vector.extract_strided_slice %156 {offsets = [0, 96], sizes = [8, 32], strides = [1, 1]} : vector<8x128xf32> to vector<8x32xf32>
    %164 = math.tanh %163 : vector<8x32xf32>
    %165 = vector.extract_strided_slice %162 {offsets = [0, 32], sizes = [8, 32], strides = [1, 1]} : vector<8x96xf32> to vector<8x32xf32>
    %166 = arith.mulf %165, %147 : vector<8x32xf32>
    %167 = vector.extract_strided_slice %162 {offsets = [0, 0], sizes = [8, 32], strides = [1, 1]} : vector<8x96xf32> to vector<8x32xf32>
    %168 = arith.mulf %167, %164 : vector<8x32xf32>
    %169 = arith.addf %166, %168 : vector<8x32xf32>
    %170 = vector.extract_strided_slice %162 {offsets = [0, 64], sizes = [8, 32], strides = [1, 1]} : vector<8x96xf32> to vector<8x32xf32>
    %171 = math.tanh %169 : vector<8x32xf32>
    %172 = arith.mulf %170, %171 : vector<8x32xf32>
    %c56 = arith.constant 56 : index
    %c0_53 = arith.constant 0 : index
    %173 = vector.load %arg9[%c56, %c0_53] : memref<64x32xf32, #tpu.memory_space<vmem>>, vector<8x32xf32>
    tpu.vector_store %arg9[%c56, %c0_53], %172 {strides = array<i32>} : memref<64x32xf32, #tpu.memory_space<vmem>>, vector<8x32xf32>,
    %c0_54 = arith.constant 0 : index
    %c0_55 = arith.constant 0 : index
    %174 = vector.load %arg9[%c0_54, %c0_55] : memref<64x32xf32, #tpu.memory_space<vmem>>, vector<64x32xf32>
    %c0_56 = arith.constant 0 : index
    %c0_57 = arith.constant 0 : index
    %175 = vector.load %arg3[%c0_56, %c0_57] : memref<32x128xf32, #tpu.memory_space<vmem>>, vector<32x128xf32>
    %cst_58 = arith.constant dense<0.000000e+00> : vector<64x128xf32>
    %176 = tpu.matmul %174, %175, %cst_58 {dimension_numbers = #tpu.dot_dimension_numbers<[1], [0], [0], [1], [0, 0, 1, 1], [], []>} : vector<64x32xf32>, vector<32x128xf32>, vector<64x128xf32> -> vector<64x128xf32>
    %c0_59 = arith.constant 0 : index
    %c0_60 = arith.constant 0 : index
    %177 = vector.load %arg5[%c0_59, %c0_60] : memref<1x128xf32, #tpu.memory_space<vmem>>, vector<1x128xf32>
    %178 = vector.broadcast %177 : vector<1x128xf32> to vector<64x128xf32>
    %179 = arith.addf %176, %178 : vector<64x128xf32>
    %c0_61 = arith.constant 0 : index
    %c0_62 = arith.constant 0 : index
    %180 = vector.load %arg10[%c0_61, %c0_62] : memref<64x128xf32, #tpu.memory_space<vmem>>, vector<64x128xf32>
    tpu.vector_store %arg10[%c0_61, %c0_62], %179 {strides = array<i32>} : memref<64x128xf32, #tpu.memory_space<vmem>>, vector<64x128xf32>,
    %cst_63 = arith.constant 0.000000e+00 : f32
    %181 = vector.broadcast %cst_63 : f32 to vector<8x32xf32>
    %c0_64 = arith.constant 0 : index
    %c0_65 = arith.constant 0 : index
    %182 = vector.load %arg10[%c0_64, %c0_65] : memref<64x128xf32, #tpu.memory_space<vmem>>, vector<8x128xf32>
    %183 = vector.extract_strided_slice %182 {offsets = [0, 0], sizes = [8, 96], strides = [1, 1]} : vector<8x128xf32> to vector<8x96xf32>
    %184 = arith.negf %183 : vector<8x96xf32>
    %185 = math.exp %184 : vector<8x96xf32>
    %cst_66 = arith.constant 1.000000e+00 : f32
    %186 = vector.broadcast %cst_66 : f32 to vector<8x96xf32>
    %187 = arith.addf %186, %185 : vector<8x96xf32>
    %188 = arith.divf %186, %187 : vector<8x96xf32>
    %189 = vector.extract_strided_slice %182 {offsets = [0, 96], sizes = [8, 32], strides = [1, 1]} : vector<8x128xf32> to vector<8x32xf32>
    %190 = math.tanh %189 : vector<8x32xf32>
    %191 = vector.extract_strided_slice %188 {offsets = [0, 32], sizes = [8, 32], strides = [1, 1]} : vector<8x96xf32> to vector<8x32xf32>
    %192 = arith.mulf %191, %181 : vector<8x32xf32>
    %193 = vector.extract_strided_slice %188 {offsets = [0, 0], sizes = [8, 32], strides = [1, 1]} : vector<8x96xf32> to vector<8x32xf32>
    %194 = arith.mulf %193, %190 : vector<8x32xf32>
    %195 = arith.addf %192, %194 : vector<8x32xf32>
    %196 = vector.extract_strided_slice %188 {offsets = [0, 64], sizes = [8, 32], strides = [1, 1]} : vector<8x96xf32> to vector<8x32xf32>
    %197 = math.tanh %195 : vector<8x32xf32>
    %198 = arith.mulf %196, %197 : vector<8x32xf32>
    %c8_67 = arith.constant 8 : index
    %c0_68 = arith.constant 0 : index
    %199 = vector.load %arg10[%c8_67, %c0_68] : memref<64x128xf32, #tpu.memory_space<vmem>>, vector<8x128xf32>
    %c0_69 = arith.constant 0 : index
    %c0_70 = arith.constant 0 : index
    %200 = vector.load %arg4[%c0_69, %c0_70] : memref<32x128xf32, #tpu.memory_space<vmem>>, vector<32x128xf32>
    %cst_71 = arith.constant dense<0.000000e+00> : vector<8x128xf32>
    %201 = tpu.matmul %198, %200, %cst_71 {dimension_numbers = #tpu.dot_dimension_numbers<[1], [0], [0], [1], [0, 0, 1, 1], [], []>} : vector<8x32xf32>, vector<32x128xf32>, vector<8x128xf32> -> vector<8x128xf32>
    %202 = arith.addf %199, %201 : vector<8x128xf32>
    %203 = vector.extract_strided_slice %202 {offsets = [0, 0], sizes = [8, 96], strides = [1, 1]} : vector<8x128xf32> to vector<8x96xf32>
    %204 = arith.negf %203 : vector<8x96xf32>
    %205 = math.exp %204 : vector<8x96xf32>
    %cst_72 = arith.constant 1.000000e+00 : f32
    %206 = vector.broadcast %cst_72 : f32 to vector<8x96xf32>
    %207 = arith.addf %206, %205 : vector<8x96xf32>
    %208 = arith.divf %206, %207 : vector<8x96xf32>
    %209 = vector.extract_strided_slice %202 {offsets = [0, 96], sizes = [8, 32], strides = [1, 1]} : vector<8x128xf32> to vector<8x32xf32>
    %210 = math.tanh %209 : vector<8x32xf32>
    %211 = vector.extract_strided_slice %208 {offsets = [0, 32], sizes = [8, 32], strides = [1, 1]} : vector<8x96xf32> to vector<8x32xf32>
    %212 = arith.mulf %211, %195 : vector<8x32xf32>
    %213 = vector.extract_strided_slice %208 {offsets = [0, 0], sizes = [8, 32], strides = [1, 1]} : vector<8x96xf32> to vector<8x32xf32>
    %214 = arith.mulf %213, %210 : vector<8x32xf32>
    %215 = arith.addf %212, %214 : vector<8x32xf32>
    %216 = vector.extract_strided_slice %208 {offsets = [0, 64], sizes = [8, 32], strides = [1, 1]} : vector<8x96xf32> to vector<8x32xf32>
    %217 = math.tanh %215 : vector<8x32xf32>
    %218 = arith.mulf %216, %217 : vector<8x32xf32>
    %c16_73 = arith.constant 16 : index
    %c0_74 = arith.constant 0 : index
    %219 = vector.load %arg10[%c16_73, %c0_74] : memref<64x128xf32, #tpu.memory_space<vmem>>, vector<8x128xf32>
    %c0_75 = arith.constant 0 : index
    %c0_76 = arith.constant 0 : index
    %220 = vector.load %arg4[%c0_75, %c0_76] : memref<32x128xf32, #tpu.memory_space<vmem>>, vector<32x128xf32>
    %cst_77 = arith.constant dense<0.000000e+00> : vector<8x128xf32>
    %221 = tpu.matmul %218, %220, %cst_77 {dimension_numbers = #tpu.dot_dimension_numbers<[1], [0], [0], [1], [0, 0, 1, 1], [], []>} : vector<8x32xf32>, vector<32x128xf32>, vector<8x128xf32> -> vector<8x128xf32>
    %222 = arith.addf %219, %221 : vector<8x128xf32>
    %223 = vector.extract_strided_slice %222 {offsets = [0, 0], sizes = [8, 96], strides = [1, 1]} : vector<8x128xf32> to vector<8x96xf32>
    %224 = arith.negf %223 : vector<8x96xf32>
    %225 = math.exp %224 : vector<8x96xf32>
    %cst_78 = arith.constant 1.000000e+00 : f32
    %226 = vector.broadcast %cst_78 : f32 to vector<8x96xf32>
    %227 = arith.addf %226, %225 : vector<8x96xf32>
    %228 = arith.divf %226, %227 : vector<8x96xf32>
    %229 = vector.extract_strided_slice %222 {offsets = [0, 96], sizes = [8, 32], strides = [1, 1]} : vector<8x128xf32> to vector<8x32xf32>
    %230 = math.tanh %229 : vector<8x32xf32>
    %231 = vector.extract_strided_slice %228 {offsets = [0, 32], sizes = [8, 32], strides = [1, 1]} : vector<8x96xf32> to vector<8x32xf32>
    %232 = arith.mulf %231, %215 : vector<8x32xf32>
    %233 = vector.extract_strided_slice %228 {offsets = [0, 0], sizes = [8, 32], strides = [1, 1]} : vector<8x96xf32> to vector<8x32xf32>
    %234 = arith.mulf %233, %230 : vector<8x32xf32>
    %235 = arith.addf %232, %234 : vector<8x32xf32>
    %236 = vector.extract_strided_slice %228 {offsets = [0, 64], sizes = [8, 32], strides = [1, 1]} : vector<8x96xf32> to vector<8x32xf32>
    %237 = math.tanh %235 : vector<8x32xf32>
    %238 = arith.mulf %236, %237 : vector<8x32xf32>
    %c24_79 = arith.constant 24 : index
    %c0_80 = arith.constant 0 : index
    %239 = vector.load %arg10[%c24_79, %c0_80] : memref<64x128xf32, #tpu.memory_space<vmem>>, vector<8x128xf32>
    %c0_81 = arith.constant 0 : index
    %c0_82 = arith.constant 0 : index
    %240 = vector.load %arg4[%c0_81, %c0_82] : memref<32x128xf32, #tpu.memory_space<vmem>>, vector<32x128xf32>
    %cst_83 = arith.constant dense<0.000000e+00> : vector<8x128xf32>
    %241 = tpu.matmul %238, %240, %cst_83 {dimension_numbers = #tpu.dot_dimension_numbers<[1], [0], [0], [1], [0, 0, 1, 1], [], []>} : vector<8x32xf32>, vector<32x128xf32>, vector<8x128xf32> -> vector<8x128xf32>
    %242 = arith.addf %239, %241 : vector<8x128xf32>
    %243 = vector.extract_strided_slice %242 {offsets = [0, 0], sizes = [8, 96], strides = [1, 1]} : vector<8x128xf32> to vector<8x96xf32>
    %244 = arith.negf %243 : vector<8x96xf32>
    %245 = math.exp %244 : vector<8x96xf32>
    %cst_84 = arith.constant 1.000000e+00 : f32
    %246 = vector.broadcast %cst_84 : f32 to vector<8x96xf32>
    %247 = arith.addf %246, %245 : vector<8x96xf32>
    %248 = arith.divf %246, %247 : vector<8x96xf32>
    %249 = vector.extract_strided_slice %242 {offsets = [0, 96], sizes = [8, 32], strides = [1, 1]} : vector<8x128xf32> to vector<8x32xf32>
    %250 = math.tanh %249 : vector<8x32xf32>
    %251 = vector.extract_strided_slice %248 {offsets = [0, 32], sizes = [8, 32], strides = [1, 1]} : vector<8x96xf32> to vector<8x32xf32>
    %252 = arith.mulf %251, %235 : vector<8x32xf32>
    %253 = vector.extract_strided_slice %248 {offsets = [0, 0], sizes = [8, 32], strides = [1, 1]} : vector<8x96xf32> to vector<8x32xf32>
    %254 = arith.mulf %253, %250 : vector<8x32xf32>
    %255 = arith.addf %252, %254 : vector<8x32xf32>
    %256 = vector.extract_strided_slice %248 {offsets = [0, 64], sizes = [8, 32], strides = [1, 1]} : vector<8x96xf32> to vector<8x32xf32>
    %257 = math.tanh %255 : vector<8x32xf32>
    %258 = arith.mulf %256, %257 : vector<8x32xf32>
    %c32_85 = arith.constant 32 : index
    %c0_86 = arith.constant 0 : index
    %259 = vector.load %arg10[%c32_85, %c0_86] : memref<64x128xf32, #tpu.memory_space<vmem>>, vector<8x128xf32>
    %c0_87 = arith.constant 0 : index
    %c0_88 = arith.constant 0 : index
    %260 = vector.load %arg4[%c0_87, %c0_88] : memref<32x128xf32, #tpu.memory_space<vmem>>, vector<32x128xf32>
    %cst_89 = arith.constant dense<0.000000e+00> : vector<8x128xf32>
    %261 = tpu.matmul %258, %260, %cst_89 {dimension_numbers = #tpu.dot_dimension_numbers<[1], [0], [0], [1], [0, 0, 1, 1], [], []>} : vector<8x32xf32>, vector<32x128xf32>, vector<8x128xf32> -> vector<8x128xf32>
    %262 = arith.addf %259, %261 : vector<8x128xf32>
    %263 = vector.extract_strided_slice %262 {offsets = [0, 0], sizes = [8, 96], strides = [1, 1]} : vector<8x128xf32> to vector<8x96xf32>
    %264 = arith.negf %263 : vector<8x96xf32>
    %265 = math.exp %264 : vector<8x96xf32>
    %cst_90 = arith.constant 1.000000e+00 : f32
    %266 = vector.broadcast %cst_90 : f32 to vector<8x96xf32>
    %267 = arith.addf %266, %265 : vector<8x96xf32>
    %268 = arith.divf %266, %267 : vector<8x96xf32>
    %269 = vector.extract_strided_slice %262 {offsets = [0, 96], sizes = [8, 32], strides = [1, 1]} : vector<8x128xf32> to vector<8x32xf32>
    %270 = math.tanh %269 : vector<8x32xf32>
    %271 = vector.extract_strided_slice %268 {offsets = [0, 32], sizes = [8, 32], strides = [1, 1]} : vector<8x96xf32> to vector<8x32xf32>
    %272 = arith.mulf %271, %255 : vector<8x32xf32>
    %273 = vector.extract_strided_slice %268 {offsets = [0, 0], sizes = [8, 32], strides = [1, 1]} : vector<8x96xf32> to vector<8x32xf32>
    %274 = arith.mulf %273, %270 : vector<8x32xf32>
    %275 = arith.addf %272, %274 : vector<8x32xf32>
    %276 = vector.extract_strided_slice %268 {offsets = [0, 64], sizes = [8, 32], strides = [1, 1]} : vector<8x96xf32> to vector<8x32xf32>
    %277 = math.tanh %275 : vector<8x32xf32>
    %278 = arith.mulf %276, %277 : vector<8x32xf32>
    %c40_91 = arith.constant 40 : index
    %c0_92 = arith.constant 0 : index
    %279 = vector.load %arg10[%c40_91, %c0_92] : memref<64x128xf32, #tpu.memory_space<vmem>>, vector<8x128xf32>
    %c0_93 = arith.constant 0 : index
    %c0_94 = arith.constant 0 : index
    %280 = vector.load %arg4[%c0_93, %c0_94] : memref<32x128xf32, #tpu.memory_space<vmem>>, vector<32x128xf32>
    %cst_95 = arith.constant dense<0.000000e+00> : vector<8x128xf32>
    %281 = tpu.matmul %278, %280, %cst_95 {dimension_numbers = #tpu.dot_dimension_numbers<[1], [0], [0], [1], [0, 0, 1, 1], [], []>} : vector<8x32xf32>, vector<32x128xf32>, vector<8x128xf32> -> vector<8x128xf32>
    %282 = arith.addf %279, %281 : vector<8x128xf32>
    %283 = vector.extract_strided_slice %282 {offsets = [0, 0], sizes = [8, 96], strides = [1, 1]} : vector<8x128xf32> to vector<8x96xf32>
    %284 = arith.negf %283 : vector<8x96xf32>
    %285 = math.exp %284 : vector<8x96xf32>
    %cst_96 = arith.constant 1.000000e+00 : f32
    %286 = vector.broadcast %cst_96 : f32 to vector<8x96xf32>
    %287 = arith.addf %286, %285 : vector<8x96xf32>
    %288 = arith.divf %286, %287 : vector<8x96xf32>
    %289 = vector.extract_strided_slice %282 {offsets = [0, 96], sizes = [8, 32], strides = [1, 1]} : vector<8x128xf32> to vector<8x32xf32>
    %290 = math.tanh %289 : vector<8x32xf32>
    %291 = vector.extract_strided_slice %288 {offsets = [0, 32], sizes = [8, 32], strides = [1, 1]} : vector<8x96xf32> to vector<8x32xf32>
    %292 = arith.mulf %291, %275 : vector<8x32xf32>
    %293 = vector.extract_strided_slice %288 {offsets = [0, 0], sizes = [8, 32], strides = [1, 1]} : vector<8x96xf32> to vector<8x32xf32>
    %294 = arith.mulf %293, %290 : vector<8x32xf32>
    %295 = arith.addf %292, %294 : vector<8x32xf32>
    %296 = vector.extract_strided_slice %288 {offsets = [0, 64], sizes = [8, 32], strides = [1, 1]} : vector<8x96xf32> to vector<8x32xf32>
    %297 = math.tanh %295 : vector<8x32xf32>
    %298 = arith.mulf %296, %297 : vector<8x32xf32>
    %c48_97 = arith.constant 48 : index
    %c0_98 = arith.constant 0 : index
    %299 = vector.load %arg10[%c48_97, %c0_98] : memref<64x128xf32, #tpu.memory_space<vmem>>, vector<8x128xf32>
    %c0_99 = arith.constant 0 : index
    %c0_100 = arith.constant 0 : index
    %300 = vector.load %arg4[%c0_99, %c0_100] : memref<32x128xf32, #tpu.memory_space<vmem>>, vector<32x128xf32>
    %cst_101 = arith.constant dense<0.000000e+00> : vector<8x128xf32>
    %301 = tpu.matmul %298, %300, %cst_101 {dimension_numbers = #tpu.dot_dimension_numbers<[1], [0], [0], [1], [0, 0, 1, 1], [], []>} : vector<8x32xf32>, vector<32x128xf32>, vector<8x128xf32> -> vector<8x128xf32>
    %302 = arith.addf %299, %301 : vector<8x128xf32>
    %303 = vector.extract_strided_slice %302 {offsets = [0, 0], sizes = [8, 96], strides = [1, 1]} : vector<8x128xf32> to vector<8x96xf32>
    %304 = arith.negf %303 : vector<8x96xf32>
    %305 = math.exp %304 : vector<8x96xf32>
    %cst_102 = arith.constant 1.000000e+00 : f32
    %306 = vector.broadcast %cst_102 : f32 to vector<8x96xf32>
    %307 = arith.addf %306, %305 : vector<8x96xf32>
    %308 = arith.divf %306, %307 : vector<8x96xf32>
    %309 = vector.extract_strided_slice %302 {offsets = [0, 96], sizes = [8, 32], strides = [1, 1]} : vector<8x128xf32> to vector<8x32xf32>
    %310 = math.tanh %309 : vector<8x32xf32>
    %311 = vector.extract_strided_slice %308 {offsets = [0, 32], sizes = [8, 32], strides = [1, 1]} : vector<8x96xf32> to vector<8x32xf32>
    %312 = arith.mulf %311, %295 : vector<8x32xf32>
    %313 = vector.extract_strided_slice %308 {offsets = [0, 0], sizes = [8, 32], strides = [1, 1]} : vector<8x96xf32> to vector<8x32xf32>
    %314 = arith.mulf %313, %310 : vector<8x32xf32>
    %315 = arith.addf %312, %314 : vector<8x32xf32>
    %316 = vector.extract_strided_slice %308 {offsets = [0, 64], sizes = [8, 32], strides = [1, 1]} : vector<8x96xf32> to vector<8x32xf32>
    %317 = math.tanh %315 : vector<8x32xf32>
    %318 = arith.mulf %316, %317 : vector<8x32xf32>
    %c56_103 = arith.constant 56 : index
    %c0_104 = arith.constant 0 : index
    %319 = vector.load %arg10[%c56_103, %c0_104] : memref<64x128xf32, #tpu.memory_space<vmem>>, vector<8x128xf32>
    %c0_105 = arith.constant 0 : index
    %c0_106 = arith.constant 0 : index
    %320 = vector.load %arg4[%c0_105, %c0_106] : memref<32x128xf32, #tpu.memory_space<vmem>>, vector<32x128xf32>
    %cst_107 = arith.constant dense<0.000000e+00> : vector<8x128xf32>
    %321 = tpu.matmul %318, %320, %cst_107 {dimension_numbers = #tpu.dot_dimension_numbers<[1], [0], [0], [1], [0, 0, 1, 1], [], []>} : vector<8x32xf32>, vector<32x128xf32>, vector<8x128xf32> -> vector<8x128xf32>
    %322 = arith.addf %319, %321 : vector<8x128xf32>
    %323 = vector.extract_strided_slice %322 {offsets = [0, 0], sizes = [8, 96], strides = [1, 1]} : vector<8x128xf32> to vector<8x96xf32>
    %324 = arith.negf %323 : vector<8x96xf32>
    %325 = math.exp %324 : vector<8x96xf32>
    %cst_108 = arith.constant 1.000000e+00 : f32
    %326 = vector.broadcast %cst_108 : f32 to vector<8x96xf32>
    %327 = arith.addf %326, %325 : vector<8x96xf32>
    %328 = arith.divf %326, %327 : vector<8x96xf32>
    %329 = vector.extract_strided_slice %322 {offsets = [0, 96], sizes = [8, 32], strides = [1, 1]} : vector<8x128xf32> to vector<8x32xf32>
    %330 = math.tanh %329 : vector<8x32xf32>
    %331 = vector.extract_strided_slice %328 {offsets = [0, 32], sizes = [8, 32], strides = [1, 1]} : vector<8x96xf32> to vector<8x32xf32>
    %332 = arith.mulf %331, %315 : vector<8x32xf32>
    %333 = vector.extract_strided_slice %328 {offsets = [0, 0], sizes = [8, 32], strides = [1, 1]} : vector<8x96xf32> to vector<8x32xf32>
    %334 = arith.mulf %333, %330 : vector<8x32xf32>
    %335 = arith.addf %332, %334 : vector<8x32xf32>
    %336 = vector.extract_strided_slice %328 {offsets = [0, 64], sizes = [8, 32], strides = [1, 1]} : vector<8x96xf32> to vector<8x32xf32>
    %337 = math.tanh %335 : vector<8x32xf32>
    %338 = arith.mulf %336, %337 : vector<8x32xf32>
    %c0_109 = arith.constant 0 : index
    %c0_110 = arith.constant 0 : index
    %339 = vector.load %arg6[%c0_109, %c0_110] : memref<32x128xf32, #tpu.memory_space<vmem>>, vector<32x128xf32>
    %cst_111 = arith.constant dense<0.000000e+00> : vector<8x128xf32>
    %340 = tpu.matmul %338, %339, %cst_111 {dimension_numbers = #tpu.dot_dimension_numbers<[1], [0], [0], [1], [0, 0, 1, 1], [], []>} : vector<8x32xf32>, vector<32x128xf32>, vector<8x128xf32> -> vector<8x128xf32>
    %c0_112 = arith.constant 0 : index
    %c0_113 = arith.constant 0 : index
    %341 = vector.load %arg7[%c0_112, %c0_113] : memref<1x128xf32, #tpu.memory_space<vmem>>, vector<1x128xf32>
    %342 = vector.broadcast %341 : vector<1x128xf32> to vector<8x128xf32>
    %343 = arith.addf %340, %342 : vector<8x128xf32>
    %c0_114 = arith.constant 0 : index
    %c0_115 = arith.constant 0 : index
    %344 = vector.load %arg8[%c0_114, %c0_115] : memref<8x128xf32, #tpu.memory_space<vmem>>, vector<8x128xf32>
    tpu.vector_store %arg8[%c0_114, %c0_115], %343 {strides = array<i32>} : memref<8x128xf32, #tpu.memory_space<vmem>>, vector<8x128xf32>,
    return
  }
  func.func @transform_0(%arg0: i32) -> (i32, i32, i32) {
    %c0_i32 = arith.constant 0 : i32
    %c0_i32_0 = arith.constant 0 : i32
    %c0_i32_1 = arith.constant 0 : i32
    return %c0_i32, %arg0, %c0_i32_0 : i32, i32, i32
  }
  func.func @transform_1(%arg0: i32) -> (i32, i32) {
    %c0_i32 = arith.constant 0 : i32
    %c0_i32_0 = arith.constant 0 : i32
    %c0_i32_1 = arith.constant 0 : i32
    return %c0_i32, %c0_i32_0 : i32, i32
  }
  func.func @transform_2(%arg0: i32) -> (i32, i32) {
    %c0_i32 = arith.constant 0 : i32
    %c0_i32_0 = arith.constant 0 : i32
    %c0_i32_1 = arith.constant 0 : i32
    return %c0_i32, %c0_i32_0 : i32, i32
  }
  func.func @transform_3(%arg0: i32) -> (i32, i32) {
    %c0_i32 = arith.constant 0 : i32
    %c0_i32_0 = arith.constant 0 : i32
    %c0_i32_1 = arith.constant 0 : i32
    return %c0_i32, %c0_i32_0 : i32, i32
  }
  func.func @transform_4(%arg0: i32) -> (i32, i32) {
    %c0_i32 = arith.constant 0 : i32
    %c0_i32_0 = arith.constant 0 : i32
    %c0_i32_1 = arith.constant 0 : i32
    return %c0_i32, %c0_i32_0 : i32, i32
  }
  func.func @transform_5(%arg0: i32) -> (i32, i32) {
    %c0_i32 = arith.constant 0 : i32
    %c0_i32_0 = arith.constant 0 : i32
    %c0_i32_1 = arith.constant 0 : i32
    return %c0_i32, %c0_i32_0 : i32, i32
  }
  func.func @transform_6(%arg0: i32) -> (i32, i32) {
    %c0_i32 = arith.constant 0 : i32
    %c0_i32_0 = arith.constant 0 : i32
    %c0_i32_1 = arith.constant 0 : i32
    return %c0_i32, %c0_i32_0 : i32, i32
  }
  func.func @transform_7(%arg0: i32) -> (i32, i32) {
    %c0_i32 = arith.constant 0 : i32
    %c0_i32_0 = arith.constant 0 : i32
    return %arg0, %c0_i32 : i32, i32
  }
}

</mosaic_0001>

<bundles_post_ra>
// kernel: lstm_forward.1
= control target key start
LH: loop header
LB: loop body
LE: loop exit
PB: predicated region body
PF: predicated region fallthrough
CT: control target
= control target key end

     0   :  { %s1366_s26 = smov 32   ;;  %vm68_vm4 = vcmask 261120   ;;  %s1613_s0 = inlined_call_operand.vmem [shape: f32[8,8,128], index: 0, kind: input, shape index: {}]   ;;  %s1614_s1 = inlined_call_operand.vmem [shape: f32[32,128], index: 1, kind: input, shape index: {}]   ;;  %s1615_s2 = inlined_call_operand.vmem [shape: f32[32,128], index: 2, kind: input, shape index: {}]   ;;  %s1616_s4 = inlined_call_operand.vmem [shape: f32[1,128], index: 4, kind: input, shape index: {}]   ;;  %s1617_s3 = inlined_call_operand.vmem [shape: f32[32,128], index: 3, kind: input, shape index: {}]   ;;  %s1618_s5 = inlined_call_operand.vmem [shape: f32[32,128], index: 5, kind: input, shape index: {}]   ;;  %s1619_s6 = inlined_call_operand.vmem [shape: f32[1,128], index: 6, kind: input, shape index: {}]   ;;  %s1620_s7 = inlined_call_operand.vmem [shape: f32[8,128], index: 7, kind: output, shape index: {}]  }
   0x1   :  { %v26_v0 = vld [vmem:[%s1613_s0] sm:$0xff]  ;;  %v75_v21 = vld [vmem:[%s1614_s1 + $0x18] sm:$0xff]  ;;  %v74_v22 = vld [vmem:[%s1614_s1 + $0x10] sm:$0xff] }
   0x2   :  { %1238 = vtanh.f32 %v26_v0  ;;  %v1184_v2 = vmul.f32 -1.442695, %v26_v0  ;;  %90 = vmatpush.msra.mxu0 %v75_v21  ;;  %161 = vmatpush.msra.mxu1 %v75_v21  ;;  %v73_v23 = vld [vmem:[%s1614_s1 + $0x8] sm:$0xff]  ;;  %v72_v24 = vld [vmem:[%s1614_s1] sm:$0xff]  ;;  %s1367_s1 = smov 64   ;;  %v1188_v54 = vld [vmem:[%s1613_s0 + $0x10] sm:$0xff] }
   0x3   :  { %303 = vmatpush.msra.mxu3 %v75_v21  ;;  %516 = vmatpush.msra.mxu2 %v75_v21  ;;  %v1185_v28 = vld [vmem:[%s1613_s0 + $0x8] sm:$0xff] }
   0x4   :  { %1240 = vpow2.f32 %v1184_v2  ;;  %91 = vmatpush.msra.mxu0 %v74_v22  ;;  %162 = vmatpush.msra.mxu1 %v74_v22 }
   0x5   :  { %304 = vmatpush.msra.mxu3 %v74_v22  ;;  %517 = vmatpush.msra.mxu2 %v74_v22 }
   0x6   :  { %92 = vmatpush.msra.mxu0 %v73_v23  ;;  %163 = vmatpush.msra.mxu1 %v73_v23 }
   0x7   :  { %305 = vmatpush.msra.mxu3 %v73_v23  ;;  %518 = vmatpush.msra.mxu2 %v73_v23 }
   0x8   :  { %v1239_v1 = vpop.eup %1238  ;;  %93 = vmatpush.msra.mxu0 %v72_v24  ;;  %164 = vmatpush.msra.mxu1 %v72_v24 }
   0x9   :  { %49 = vrot.lane.b32.xlu0 %v1239_v1, %s1366_s26  ;;  %306 = vmatpush.msra.mxu3 %v72_v24 }
   0xa   :  { %v1241_v3 = vpop.eup %1240  ;;  %232 = vmatpush.msrb.mxu0 %v75_v21  ;;  %445 = vmatpush.msrb.mxu1 %v75_v21 }
   0xb   :  { %v30_v4 = vadd.f32 1.0, %v1241_v3  ;;  %519 = vmatpush.msra.mxu2 %v72_v24 }
   0xc   :  { %233 = vmatpush.msrb.mxu0 %v74_v22  ;;  %446 = vmatpush.msrb.mxu1 %v74_v22 }
   0xd   :  { %1242 = vrcp.f32 %v30_v4  ;;  %vm36_vm0 = vweird.f32 %v30_v4  ;;  %v42_v9 = vand.u32 2147483648, %v30_v4  ;;  %v40_v11 = vand.u32 2147483647, %v30_v4 }
   0xe   :  { %234 = vmatpush.msrb.mxu0 %v73_v23  ;;  %447 = vmatpush.msrb.mxu1 %v73_v23 }
   0xf   :  { %v43_v12 = vor.u32 1.1754944e-38, %v42_v9  ;;  %vm41_vm3 = vcmp.eq.f32.partialorder %v40_v11, 8.507059e+37 }
  0x10   :  { %235 = vmatpush.msrb.mxu0 %v72_v24  ;;  %448 = vmatpush.msrb.mxu1 %v72_v24 }
  0x13   :  { %v1243_v5 = vpop.eup %1242 }
  0x14   :  { %v32_v6 = vmul.f32 %v1243_v5, %v30_v4  ;;  %vm37_vm1 = vweird.f32 %v1243_v5 }
  0x15   :  { %vm38_vm2 = vmor %vm36_vm0, %vm37_vm1 }
  0x16   :  { %v33_v7 = vsub.f32 1.0, %v32_v6 }
  0x18   :  { %v34_v8 = vmul.f32 %v1243_v5, %v33_v7 }
  0x1a   :  { %v35_v10 = vadd.f32 %v1243_v5, %v34_v8 }
  0x1c   :  { %v39_v13 = vsel %vm38_vm2, %v1243_v5, %v35_v10 }
  0x1d   :  { %v44_v14 = vsel %vm41_vm3, %v43_v12, %v39_v13 }
  0x1e   :  { %v47_v17 = vmul.f32 0.0, %v44_v14 }
  0x7b   :  { %v50_v15 = vpop.permute.xlu0 %49 }
  0x7c   :  { %v52_v16 = vmul.f32 %v50_v15, %v44_v14 }
  0x7e   :  { %54 = vrot.lane.b32.xlu0 %v52_v16, %s1366_s26  ;;  %v1191_v16 = vld [vmem:[%s1613_s0 + $0x18] sm:$0xff] }
  0xf0   :  { %v55_v18 = vpop.permute.xlu0 %54 }
  0xf1   :  { %v1413_v19 = vadd.f32 %v55_v18, %v47_v17 }
  0xf3   :  { %1244 = vtanh.f32 %v1413_v19 }
  0xf9   :  { %v1245_v20 = vpop.eup %1244 }
  0xfa   :  { %60 = vrot.lane.b32.xlu1 %v1245_v20, %s1366_s26 }
 0x16c   :  { %v61_v25 = vpop.permute.xlu1 %60 }
 0x16d   :  { %v63_v26 = vmul.f32 %v61_v25, %v44_v14 }
 0x16f   :  { %65 = vrot.lane.b32.xlu1 %v63_v26, %s1367_s1 }
 0x1e1   :  { %v66_v27 = vpop.permute.xlu1 %65 }
 0x1e2   :  { %69 = vst.msk [vmem:[#allocation2] sm:$0xff] %vm68_vm4, %v66_v27  ;;  %1186 = vmatmul.msk.f32.vlgmr.msra.gmra.mxu0 %vm68_vm4, %v66_v27 }
 0x1e3   :  { %374 = vmatpush.msra.mxu0 %v75_v21 }
 0x1e5   :  { %375 = vmatpush.msra.mxu0 %v74_v22 }
 0x1e7   :  { %376 = vmatpush.msra.mxu0 %v73_v23 }
 0x1e9   :  { %377 = vmatpush.msra.mxu0 %v72_v24 }
 0x25f   :  { %v95_v29 = vpop.f32.mrf.mxu0 }
 0x260   :  { %v98_v30 = vadd.f32 %v1185_v28, %v95_v29 }
 0x262   :  { %1246 = vtanh.f32 %v98_v30  ;;  %v1187_v32 = vmul.f32 -1.442695, %v98_v30 }
 0x264   :  { %1248 = vpow2.f32 %v1187_v32 }
 0x268   :  { %v1247_v31 = vpop.eup %1246 }
 0x269   :  { %121 = vrot.lane.b32.xlu2 %v1247_v31, %s1366_s26 }
 0x26a   :  { %v1249_v33 = vpop.eup %1248 }
 0x26b   :  { %v102_v34 = vadd.f32 1.0, %v1249_v33 }
 0x26d   :  { %1250 = vrcp.f32 %v102_v34  ;;  %v114_v40 = vand.u32 2147483648, %v102_v34  ;;  %vm108_vm6 = vweird.f32 %v102_v34  ;;  %v112_v41 = vand.u32 2147483647, %v102_v34 }
 0x26f   :  { %v115_v43 = vor.u32 1.1754944e-38, %v114_v40  ;;  %vm113_vm8 = vcmp.eq.f32.partialorder %v112_v41, 8.507059e+37  ;;  %v578_v41 = vld [vmem:[%s1615_s2 + $0x18] sm:$0xff] }
 0x270   :  { %1230 = vmatpush.msrb.mxu3 %v578_v41  ;;  %619 = vmatpush.msrb.mxu2 %v578_v41 }
 0x273   :  { %v1251_v35 = vpop.eup %1250 }
 0x274   :  { %v104_v36 = vmul.f32 %v1251_v35, %v102_v34  ;;  %vm109_vm5 = vweird.f32 %v1251_v35 }
 0x275   :  { %vm110_vm7 = vmor %vm108_vm6, %vm109_vm5 }
 0x276   :  { %v105_v37 = vsub.f32 1.0, %v104_v36 }
 0x278   :  { %v106_v38 = vmul.f32 %v1251_v35, %v105_v37 }
 0x27a   :  { %v107_v39 = vadd.f32 %v1251_v35, %v106_v38 }
 0x27c   :  { %v111_v42 = vsel %vm110_vm7, %v1251_v35, %v107_v39 }
 0x27d   :  { %v116_v45 = vsel %vm113_vm8, %v115_v43, %v111_v42  ;;  %v577_v42 = vld [vmem:[%s1615_s2 + $0x10] sm:$0xff]  ;;  %v576_v43 = vld [vmem:[%s1615_s2 + $0x8] sm:$0xff] }
 0x27e   :  { %v119_v47 = vmul.f32 %v116_v45, %v1413_v19  ;;  %1231 = vmatpush.msrb.mxu3 %v577_v42  ;;  %620 = vmatpush.msrb.mxu2 %v577_v42 }
 0x280   :  { %1232 = vmatpush.msrb.mxu3 %v576_v43  ;;  %621 = vmatpush.msrb.mxu2 %v576_v43 }
 0x2c3   :  { %v122_v44 = vpop.permute.xlu2 %121 }
 0x2c4   :  { %v124_v46 = vmul.f32 %v122_v44, %v116_v45  ;;  %v575_v44 = vld [vmem:[%s1615_s2] sm:$0xff] }
 0x2c5   :  { %1233 = vmatpush.msrb.mxu3 %v575_v44  ;;  %622 = vmatpush.msrb.mxu2 %v575_v44 }
 0x2c6   :  { %126 = vrot.lane.b32.xlu2 %v124_v46, %s1366_s26 }
 0x320   :  { %v127_v48 = vpop.permute.xlu2 %126 }
 0x321   :  { %v129_v49 = vadd.f32 %v127_v48, %v119_v47  ;;  %v1194_v47 = vld [vmem:[%s1613_s0 + $0x20] sm:$0xff] }
 0x323   :  { %1252 = vtanh.f32 %v129_v49 }
 0x329   :  { %v1253_v50 = vpop.eup %1252 }
 0x32a   :  { %132 = vrot.lane.b32.xlu0 %v1253_v50, %s1366_s26 }
 0x39c   :  { %v133_v51 = vpop.permute.xlu0 %132 }
 0x39d   :  { %v135_v52 = vmul.f32 %v133_v51, %v116_v45 }
 0x39f   :  { %137 = vrot.lane.b32.xlu1 %v135_v52, %s1367_s1 }
 0x411   :  { %v138_v53 = vpop.permute.xlu1 %137 }
 0x412   :  { %140 = vst.msk [vmem:[#allocation2 + $0x8] sm:$0xff] %vm68_vm4, %v138_v53  ;;  %1189 = vmatmul.msk.f32.vlgmr.msra.gmra.mxu1 %vm68_vm4, %v138_v53 }
 0x48f   :  { %v166_v55 = vpop.f32.mrf.mxu1 }
 0x490   :  { %v169_v56 = vadd.f32 %v1188_v54, %v166_v55 }
 0x492   :  { %1254 = vtanh.f32 %v169_v56  ;;  %v1190_v58 = vmul.f32 -1.442695, %v169_v56 }
 0x494   :  { %1256 = vpow2.f32 %v1190_v58 }
 0x498   :  { %v1255_v57 = vpop.eup %1254 }
 0x499   :  { %192 = vrot.lane.b32.xlu2 %v1255_v57, %s1366_s26 }
 0x49a   :  { %v1257_v59 = vpop.eup %1256 }
 0x49b   :  { %v173_v60 = vadd.f32 1.0, %v1257_v59 }
 0x49d   :  { %1258 = vrcp.f32 %v173_v60  ;;  %v185_v2 = vand.u32 2147483648, %v173_v60  ;;  %vm179_vm10 = vweird.f32 %v173_v60  ;;  %v183_v3 = vand.u32 2147483647, %v173_v60 }
 0x49f   :  { %v186_v5 = vor.u32 1.1754944e-38, %v185_v2  ;;  %vm184_vm12 = vcmp.eq.f32.partialorder %v183_v3, 8.507059e+37 }
 0x4a3   :  { %v1259_v61 = vpop.eup %1258 }
 0x4a4   :  { %v175_v62 = vmul.f32 %v1259_v61, %v173_v60  ;;  %vm180_vm9 = vweird.f32 %v1259_v61 }
 0x4a5   :  { %vm181_vm11 = vmor %vm179_vm10, %vm180_vm9 }
 0x4a6   :  { %v176_v63 = vsub.f32 1.0, %v175_v62 }
 0x4a8   :  { %v177_v0 = vmul.f32 %v1259_v61, %v176_v63 }
 0x4aa   :  { %v178_v1 = vadd.f32 %v1259_v61, %v177_v0 }
 0x4ac   :  { %v182_v4 = vsel %vm181_vm11, %v1259_v61, %v178_v1 }
 0x4ad   :  { %v187_v7 = vsel %vm184_vm12, %v186_v5, %v182_v4 }
 0x4ae   :  { %v190_v9 = vmul.f32 %v187_v7, %v129_v49 }
 0x4f3   :  { %v193_v6 = vpop.permute.xlu2 %192 }
 0x4f4   :  { %v195_v8 = vmul.f32 %v193_v6, %v187_v7 }
 0x4f6   :  { %197 = vrot.lane.b32.xlu0 %v195_v8, %s1366_s26 }
 0x568   :  { %v198_v10 = vpop.permute.xlu0 %197 }
 0x569   :  { %v200_v11 = vadd.f32 %v198_v10, %v190_v9  ;;  %v1197_v10 = vld [vmem:[%s1613_s0 + $0x28] sm:$0xff] }
 0x56b   :  { %1260 = vtanh.f32 %v200_v11 }
 0x571   :  { %v1261_v12 = vpop.eup %1260 }
 0x572   :  { %203 = vrot.lane.b32.xlu1 %v1261_v12, %s1366_s26 }
 0x5e4   :  { %v204_v13 = vpop.permute.xlu1 %203 }
 0x5e5   :  { %v206_v14 = vmul.f32 %v204_v13, %v187_v7 }
 0x5e7   :  { %208 = vrot.lane.b32.xlu2 %v206_v14, %s1367_s1 }
 0x641   :  { %v209_v15 = vpop.permute.xlu2 %208 }
 0x642   :  { %211 = vst.msk [vmem:[#allocation2 + $0x10] sm:$0xff] %vm68_vm4, %v209_v15  ;;  %1192 = vmatmul.msk.f32.vlgmr.msrb.gmra.mxu0 %vm68_vm4, %v209_v15 }
 0x6bf   :  { %v237_v17 = vpop.f32.mrf.mxu0 }
 0x6c0   :  { %v240_v18 = vadd.f32 %v1191_v16, %v237_v17 }
 0x6c2   :  { %1262 = vtanh.f32 %v240_v18  ;;  %v1193_v20 = vmul.f32 -1.442695, %v240_v18 }
 0x6c4   :  { %1264 = vpow2.f32 %v1193_v20 }
 0x6c8   :  { %v1263_v19 = vpop.eup %1262 }
 0x6c9   :  { %263 = vrot.lane.b32.xlu0 %v1263_v19, %s1366_s26 }
 0x6ca   :  { %v1265_v21 = vpop.eup %1264 }
 0x6cb   :  { %v244_v22 = vadd.f32 1.0, %v1265_v21 }
 0x6cd   :  { %1266 = vrcp.f32 %v244_v22  ;;  %v256_v28 = vand.u32 2147483648, %v244_v22  ;;  %vm250_vm14 = vweird.f32 %v244_v22  ;;  %v254_v29 = vand.u32 2147483647, %v244_v22 }
 0x6cf   :  { %v257_v31 = vor.u32 1.1754944e-38, %v256_v28  ;;  %vm255_vm0 = vcmp.eq.f32.partialorder %v254_v29, 8.507059e+37 }
 0x6d3   :  { %v1267_v23 = vpop.eup %1266 }
 0x6d4   :  { %v246_v24 = vmul.f32 %v1267_v23, %v244_v22  ;;  %vm251_vm13 = vweird.f32 %v1267_v23 }
 0x6d5   :  { %vm252_vm15 = vmor %vm250_vm14, %vm251_vm13 }
 0x6d6   :  { %v247_v25 = vsub.f32 1.0, %v246_v24 }
 0x6d8   :  { %v248_v26 = vmul.f32 %v1267_v23, %v247_v25 }
 0x6da   :  { %v249_v27 = vadd.f32 %v1267_v23, %v248_v26 }
 0x6dc   :  { %v253_v30 = vsel %vm252_vm15, %v1267_v23, %v249_v27 }
 0x6dd   :  { %v258_v33 = vsel %vm255_vm0, %v257_v31, %v253_v30 }
 0x6de   :  { %v261_v35 = vmul.f32 %v258_v33, %v200_v11 }
 0x73b   :  { %v264_v32 = vpop.permute.xlu0 %263 }
 0x73c   :  { %v266_v34 = vmul.f32 %v264_v32, %v258_v33 }
 0x73e   :  { %268 = vrot.lane.b32.xlu1 %v266_v34, %s1366_s26 }
 0x7b0   :  { %v269_v36 = vpop.permute.xlu1 %268 }
 0x7b1   :  { %v271_v37 = vadd.f32 %v269_v36, %v261_v35 }
 0x7b3   :  { %1268 = vtanh.f32 %v271_v37 }
 0x7b9   :  { %v1269_v38 = vpop.eup %1268 }
 0x7ba   :  { %274 = vrot.lane.b32.xlu2 %v1269_v38, %s1366_s26 }
 0x814   :  { %v275_v39 = vpop.permute.xlu2 %274 }
 0x815   :  { %v277_v40 = vmul.f32 %v275_v39, %v258_v33 }
 0x817   :  { %279 = vrot.lane.b32.xlu0 %v277_v40, %s1367_s1 }
 0x889   :  { %v280_v45 = vpop.permute.xlu0 %279 }
 0x88a   :  { %282 = vst.msk [vmem:[#allocation2 + $0x18] sm:$0xff] %vm68_vm4, %v280_v45  ;;  %1195 = vmatmul.msk.f32.vlgmr.msra.gmra.mxu3 %vm68_vm4, %v280_v45 }
 0x891   :  { %v570_v46 = vld [vmem:[#allocation2 + $0x18] sm:$0xff] }
 0x892   :  { %1209 = vmatmul.msk.f32.vlgmr.msrb.gmra.mxu3 %vm68_vm4, %v570_v46 }
 0x90d   :  { %v308_v48 = vpop.f32.mrf.mxu3 }
 0x90e   :  { %v311_v49 = vadd.f32 %v1194_v47, %v308_v48 }
 0x910   :  { %1270 = vtanh.f32 %v311_v49  ;;  %v1196_v51 = vmul.f32 -1.442695, %v311_v49 }
 0x912   :  { %1272 = vpow2.f32 %v1196_v51 }
 0x916   :  { %v1271_v50 = vpop.eup %1270 }
 0x917   :  { %334 = vrot.lane.b32.xlu1 %v1271_v50, %s1366_s26 }
 0x918   :  { %v1273_v52 = vpop.eup %1272 }
 0x919   :  { %v315_v53 = vadd.f32 1.0, %v1273_v52 }
 0x91b   :  { %1274 = vrcp.f32 %v315_v53  ;;  %v327_v59 = vand.u32 2147483648, %v315_v53  ;;  %vm321_vm2 = vweird.f32 %v315_v53  ;;  %v325_v60 = vand.u32 2147483647, %v315_v53 }
 0x91d   :  { %v328_v62 = vor.u32 1.1754944e-38, %v327_v59  ;;  %vm326_vm5 = vcmp.eq.f32.partialorder %v325_v60, 8.507059e+37 }
 0x921   :  { %v1275_v54 = vpop.eup %1274 }
 0x922   :  { %v317_v55 = vmul.f32 %v1275_v54, %v315_v53  ;;  %vm322_vm1 = vweird.f32 %v1275_v54 }
 0x923   :  { %vm323_vm3 = vmor %vm321_vm2, %vm322_vm1 }
 0x924   :  { %v318_v56 = vsub.f32 1.0, %v317_v55 }
 0x926   :  { %v319_v57 = vmul.f32 %v1275_v54, %v318_v56 }
 0x928   :  { %v320_v58 = vadd.f32 %v1275_v54, %v319_v57 }
 0x92a   :  { %v324_v61 = vsel %vm323_vm3, %v1275_v54, %v320_v58 }
 0x92b   :  { %v329_v0 = vsel %vm326_vm5, %v328_v62, %v324_v61 }
 0x92c   :  { %v332_v2 = vmul.f32 %v329_v0, %v271_v37  ;;  %v1200_v37 = vld [vmem:[%s1613_s0 + $0x30] sm:$0xff] }
 0x989   :  { %v335_v63 = vpop.permute.xlu1 %334 }
 0x98a   :  { %v337_v1 = vmul.f32 %v335_v63, %v329_v0  ;;  %v567_v63 = vld [vmem:[#allocation2] sm:$0xff] }
 0x98c   :  { %339 = vrot.lane.b32.xlu2 %v337_v1, %s1366_s26  ;;  %v568_v1 = vld [vmem:[#allocation2 + $0x8] sm:$0xff] }
 0x9e6   :  { %v340_v3 = vpop.permute.xlu2 %339 }
 0x9e7   :  { %v342_v4 = vadd.f32 %v340_v3, %v332_v2  ;;  %v569_v2 = vld [vmem:[#allocation2 + $0x10] sm:$0xff] }
 0x9e9   :  { %1276 = vtanh.f32 %v342_v4 }
 0x9ef   :  { %v1277_v5 = vpop.eup %1276 }
 0x9f0   :  { %345 = vrot.lane.b32.xlu0 %v1277_v5, %s1366_s26 }
 0xa62   :  { %v346_v6 = vpop.permute.xlu0 %345 }
 0xa63   :  { %v348_v7 = vmul.f32 %v346_v6, %v329_v0 }
 0xa65   :  { %350 = vrot.lane.b32.xlu1 %v348_v7, %s1367_s1 }
 0xad7   :  { %v351_v8 = vpop.permute.xlu1 %350 }
 0xad8   :  { %353 = vst.msk [vmem:[#allocation2 + $0x20] sm:$0xff] %vm68_vm4, %v351_v8  ;;  %1198 = vmatmul.msk.f32.vlgmr.msra.gmra.mxu0 %vm68_vm4, %v351_v8 }
 0xadf   :  { %v571_v9 = vld [vmem:[#allocation2 + $0x20] sm:$0xff] }
 0xae0   :  { %1210 = vmatmul.msk.f32.gmra.mxu3 %vm68_vm4, %v571_v9 }
 0xb55   :  { %v379_v11 = vpop.f32.mrf.mxu0 }
 0xb56   :  { %v382_v12 = vadd.f32 %v1197_v10, %v379_v11 }
 0xb58   :  { %1278 = vtanh.f32 %v382_v12  ;;  %v1199_v14 = vmul.f32 -1.442695, %v382_v12 }
 0xb5a   :  { %1280 = vpow2.f32 %v1199_v14 }
 0xb5e   :  { %v1279_v13 = vpop.eup %1278 }
 0xb5f   :  { %405 = vrot.lane.b32.xlu2 %v1279_v13, %s1366_s26 }
 0xb60   :  { %v1281_v15 = vpop.eup %1280 }
 0xb61   :  { %v386_v16 = vadd.f32 1.0, %v1281_v15 }
 0xb63   :  { %1282 = vrcp.f32 %v386_v16  ;;  %v398_v22 = vand.u32 2147483648, %v386_v16  ;;  %vm392_vm7 = vweird.f32 %v386_v16  ;;  %v396_v23 = vand.u32 2147483647, %v386_v16 }
 0xb65   :  { %v399_v25 = vor.u32 1.1754944e-38, %v398_v22  ;;  %vm397_vm9 = vcmp.eq.f32.partialorder %v396_v23, 8.507059e+37 }
 0xb69   :  { %v1283_v17 = vpop.eup %1282 }
 0xb6a   :  { %v388_v18 = vmul.f32 %v1283_v17, %v386_v16  ;;  %vm393_vm6 = vweird.f32 %v1283_v17 }
 0xb6b   :  { %vm394_vm8 = vmor %vm392_vm7, %vm393_vm6 }
 0xb6c   :  { %v389_v19 = vsub.f32 1.0, %v388_v18 }
 0xb6e   :  { %v390_v20 = vmul.f32 %v1283_v17, %v389_v19 }
 0xb70   :  { %v391_v21 = vadd.f32 %v1283_v17, %v390_v20 }
 0xb72   :  { %v395_v24 = vsel %vm394_vm8, %v1283_v17, %v391_v21 }
 0xb73   :  { %v400_v27 = vsel %vm397_vm9, %v399_v25, %v395_v24 }
 0xb74   :  { %v403_v29 = vmul.f32 %v400_v27, %v342_v4  ;;  %v1514_v4 = vld [vmem:[%s1616_s4] ss:$0 sm:$0xff] }
 0xbb9   :  { %v406_v26 = vpop.permute.xlu2 %405 }
 0xbba   :  { %v408_v28 = vmul.f32 %v406_v26, %v400_v27 }
 0xbbc   :  { %410 = vrot.lane.b32.xlu0 %v408_v28, %s1366_s26  ;;  %v697_v28 = vld [vmem:[%s1617_s3 + $0x10] sm:$0xff] }
 0xc2e   :  { %v411_v30 = vpop.permute.xlu0 %410 }
 0xc2f   :  { %v413_v31 = vadd.f32 %v411_v30, %v403_v29  ;;  %v696_v29 = vld [vmem:[%s1617_s3 + $0x8] sm:$0xff]  ;;  %v695_v30 = vld [vmem:[%s1617_s3] sm:$0xff] }
 0xc31   :  { %1284 = vtanh.f32 %v413_v31 }
 0xc37   :  { %v1285_v32 = vpop.eup %1284 }
 0xc38   :  { %416 = vrot.lane.b32.xlu1 %v1285_v32, %s1366_s26 }
 0xcaa   :  { %v417_v33 = vpop.permute.xlu1 %416 }
 0xcab   :  { %v419_v34 = vmul.f32 %v417_v33, %v400_v27  ;;  %v698_v27 = vld [vmem:[%s1617_s3 + $0x18] sm:$0xff] }
 0xcac   :  { %716 = vmatpush.msrb.mxu0 %v698_v27  ;;  %780 = vmatpush.msra.mxu1 %v698_v27 }
 0xcad   :  { %421 = vrot.lane.b32.xlu2 %v419_v34, %s1367_s1 }
 0xcae   :  { %717 = vmatpush.msrb.mxu0 %v697_v28  ;;  %781 = vmatpush.msra.mxu1 %v697_v28 }
 0xcb0   :  { %718 = vmatpush.msrb.mxu0 %v696_v29  ;;  %782 = vmatpush.msra.mxu1 %v696_v29 }
 0xcb2   :  { %719 = vmatpush.msrb.mxu0 %v695_v30  ;;  %783 = vmatpush.msra.mxu1 %v695_v30 }
 0xcb4   :  { %908 = vmatpush.msra.mxu0 %v698_v27 }
 0xcb6   :  { %909 = vmatpush.msra.mxu0 %v697_v28 }
 0xcb8   :  { %910 = vmatpush.msra.mxu0 %v696_v29 }
 0xcba   :  { %911 = vmatpush.msra.mxu0 %v695_v30 }
 0xd07   :  { %v422_v35 = vpop.permute.xlu2 %421 }
 0xd08   :  { %424 = vst.msk [vmem:[#allocation2 + $0x28] sm:$0xff] %vm68_vm4, %v422_v35  ;;  %1201 = vmatmul.msk.f32.vlgmr.msrb.gmra.mxu1 %vm68_vm4, %v422_v35 }
 0xd09   :  { %972 = vmatpush.msrb.mxu1 %v698_v27 }
 0xd0b   :  { %973 = vmatpush.msrb.mxu1 %v697_v28 }
 0xd0d   :  { %974 = vmatpush.msrb.mxu1 %v696_v29 }
 0xd0f   :  { %v572_v36 = vld [vmem:[#allocation2 + $0x28] sm:$0xff]  ;;  %975 = vmatpush.msrb.mxu1 %v695_v30 }
 0xd10   :  { %1211 = vmatmul.msk.f32.gmra.mxu3 %vm68_vm4, %v572_v36 }
 0xd85   :  { %v450_v38 = vpop.f32.mrf.mxu1 }
 0xd86   :  { %v453_v39 = vadd.f32 %v1200_v37, %v450_v38 }
 0xd88   :  { %1286 = vtanh.f32 %v453_v39  ;;  %v1202_v41 = vmul.f32 -1.442695, %v453_v39 }
 0xd8a   :  { %1288 = vpow2.f32 %v1202_v41 }
 0xd8e   :  { %v1287_v40 = vpop.eup %1286 }
 0xd8f   :  { %476 = vrot.lane.b32.xlu0 %v1287_v40, %s1366_s26 }
 0xd90   :  { %v1289_v42 = vpop.eup %1288 }
 0xd91   :  { %v457_v43 = vadd.f32 1.0, %v1289_v42 }
 0xd93   :  { %1290 = vrcp.f32 %v457_v43  ;;  %v469_v49 = vand.u32 2147483648, %v457_v43  ;;  %vm463_vm11 = vweird.f32 %v457_v43  ;;  %v467_v50 = vand.u32 2147483647, %v457_v43 }
 0xd95   :  { %v470_v52 = vor.u32 1.1754944e-38, %v469_v49  ;;  %vm468_vm13 = vcmp.eq.f32.partialorder %v467_v50, 8.507059e+37 }
 0xd99   :  { %v1291_v44 = vpop.eup %1290 }
 0xd9a   :  { %v459_v45 = vmul.f32 %v1291_v44, %v457_v43  ;;  %vm464_vm10 = vweird.f32 %v1291_v44 }
 0xd9b   :  { %vm465_vm12 = vmor %vm463_vm11, %vm464_vm10 }
 0xd9c   :  { %v460_v46 = vsub.f32 1.0, %v459_v45 }
 0xd9e   :  { %v461_v47 = vmul.f32 %v1291_v44, %v460_v46 }
 0xda0   :  { %v462_v48 = vadd.f32 %v1291_v44, %v461_v47 }
 0xda2   :  { %v466_v51 = vsel %vm465_vm12, %v1291_v44, %v462_v48 }
 0xda3   :  { %v471_v54 = vsel %vm468_vm13, %v470_v52, %v466_v51 }
 0xda4   :  { %v474_v56 = vmul.f32 %v471_v54, %v413_v31 }
 0xe01   :  { %v477_v53 = vpop.permute.xlu0 %476 }
 0xe02   :  { %v479_v55 = vmul.f32 %v477_v53, %v471_v54 }
 0xe04   :  { %481 = vrot.lane.b32.xlu1 %v479_v55, %s1366_s26 }
 0xe76   :  { %v482_v57 = vpop.permute.xlu1 %481 }
 0xe77   :  { %v1498_v58 = vadd.f32 %v482_v57, %v474_v56 }
 0xe79   :  { %1292 = vtanh.f32 %v1498_v58 }
 0xe7f   :  { %v1293_v59 = vpop.eup %1292 }
 0xe80   :  { %487 = vrot.lane.b32.xlu2 %v1293_v59, %s1366_s26 }
 0xeda   :  { %v488_v60 = vpop.permute.xlu2 %487 }
 0xedb   :  { %v490_v61 = vmul.f32 %v488_v60, %v471_v54 }
 0xedd   :  { %492 = vrot.lane.b32.xlu0 %v490_v61, %s1367_s1 }
 0xf4f   :  { %v493_v62 = vpop.permute.xlu0 %492 }
 0xf50   :  { %495 = vst.msk [vmem:[#allocation2 + $0x30] sm:$0xff] %vm68_vm4, %v493_v62  ;;  %1204 = vmatmul.msk.f32.vlgmr.msra.gmra.mxu2 %vm68_vm4, %v493_v62 }
 0xf51   :  { %844 = vmatpush.msra.mxu2 %v698_v27 }
 0xf53   :  { %845 = vmatpush.msra.mxu2 %v697_v28 }
 0xf55   :  { %846 = vmatpush.msra.mxu2 %v696_v29 }
 0xf57   :  { %v573_v0 = vld [vmem:[#allocation2 + $0x30] sm:$0xff]  ;;  %847 = vmatpush.msra.mxu2 %v695_v30 }
 0xf58   :  { %1206 = vmatmul.msk.f32.vlgmr.msrb.gmra.mxu2 %vm68_vm4, %v567_v63  ;;  %1212 = vmatmul.msk.f32.gmra.mxu3 %vm68_vm4, %v573_v0 }
 0xf59   :  { %1036 = vmatpush.msrb.mxu2 %v698_v27 }
 0xf5b   :  { %1037 = vmatpush.msrb.mxu2 %v697_v28 }
 0xf5d   :  { %1038 = vmatpush.msrb.mxu2 %v696_v29 }
 0xf5f   :  { %1039 = vmatpush.msrb.mxu2 %v695_v30 }
 0xf60   :  { %1207 = vmatmul.msk.f32.gmra.mxu2 %vm68_vm4, %v568_v1 }
 0xf68   :  { %1208 = vmatmul.msk.f32.gmra.mxu2 %vm68_vm4, %v569_v2 }
 0xfd3   :  { %v1509_v3 = vpop.f32.mrf.mxu2 }
 0xfdb   :  { %v624_v5 = vpop.f32.mrf.mxu2 }
 0xfdc   :  { %v625_v6 = vadd.f32 %v1514_v4, %v624_v5 }
 0xfde   :  { %1294 = vtanh.f32 %v625_v6  ;;  %v1214_v8 = vmul.f32 -1.442695, %v625_v6 }
 0xfe0   :  { %1296 = vpow2.f32 %v1214_v8 }
 0xfe3   :  { %v627_v34 = vpop.f32.mrf.mxu2 }
 0xfe4   :  { %v1295_v7 = vpop.eup %1294  ;;  %v628_v35 = vadd.f32 %v1514_v4, %v627_v34 }
 0xfe5   :  { %679 = vrot.lane.b32.xlu1 %v1295_v7, %s1366_s26 }
 0xfe6   :  { %v1297_v9 = vpop.eup %1296 }
 0xfe7   :  { %v660_v10 = vadd.f32 1.0, %v1297_v9 }
 0xfe9   :  { %1298 = vrcp.f32 %v660_v10  ;;  %v672_v16 = vand.u32 2147483648, %v660_v10  ;;  %vm666_vm15 = vweird.f32 %v660_v10  ;;  %v670_v17 = vand.u32 2147483647, %v660_v10 }
 0xfeb   :  { %v673_v19 = vor.u32 1.1754944e-38, %v672_v16  ;;  %vm671_vm1 = vcmp.eq.f32.partialorder %v670_v17, 8.507059e+37  ;;  %v630_v62 = vpop.f32.mrf.mxu2 }
 0xfec   :  { %v631_v63 = vadd.f32 %v1514_v4, %v630_v62 }
 0xfef   :  { %v1299_v11 = vpop.eup %1298 }
 0xff0   :  { %v662_v12 = vmul.f32 %v1299_v11, %v660_v10  ;;  %vm667_vm14 = vweird.f32 %v1299_v11 }
 0xff1   :  { %vm668_vm0 = vmor %vm666_vm15, %vm667_vm14 }
 0xff2   :  { %v663_v13 = vsub.f32 1.0, %v662_v12 }
 0xff4   :  { %v664_v14 = vmul.f32 %v1299_v11, %v663_v13 }
 0xff6   :  { %v665_v15 = vadd.f32 %v1299_v11, %v664_v14 }
 0xff8   :  { %v669_v18 = vsel %vm668_vm0, %v1299_v11, %v665_v15 }
 0xff9   :  { %v674_v21 = vsel %vm671_vm1, %v673_v19, %v669_v18 }
 0xffa   :  { %v677_v23 = vmul.f32 0.0, %v674_v21 }
0x1057   :  { %v680_v20 = vpop.permute.xlu1 %679 }
0x1058   :  { %v682_v22 = vmul.f32 %v680_v20, %v674_v21 }
0x105a   :  { %684 = vrot.lane.b32.xlu2 %v682_v22, %s1366_s26 }
0x10b4   :  { %v685_v24 = vpop.permute.xlu2 %684 }
0x10b5   :  { %v1519_v25 = vadd.f32 %v685_v24, %v677_v23 }
0x10b7   :  { %1300 = vtanh.f32 %v1519_v25 }
0x10bd   :  { %v1301_v26 = vpop.eup %1300 }
0x10be   :  { %690 = vrot.lane.b32.xlu0 %v1301_v26, %s1366_s26 }
0x1130   :  { %v691_v31 = vpop.permute.xlu0 %690 }
0x1131   :  { %v693_v32 = vmul.f32 %v691_v31, %v674_v21 }
0x1133   :  { %700 = vrot.lane.b32.xlu1 %v693_v32, %s1367_s1 }
0x11a5   :  { %v701_v33 = vpop.permute.xlu1 %700 }
0x11a6   :  { %1215 = vmatmul.msk.f32.vlgmr.msrb.gmra.mxu0 %vm68_vm4, %v701_v33 }
0x11a7   :  { %1100 = vmatpush.msrb.mxu0 %v698_v27  ;;  %v633_v27 = vpop.f32.mrf.mxu3 }
0x11a9   :  { %1101 = vmatpush.msrb.mxu0 %v697_v28  ;;  %v634_v28 = vadd.f32 %v1514_v4, %v633_v27 }
0x11ab   :  { %1102 = vmatpush.msrb.mxu0 %v696_v29 }
0x11ad   :  { %1103 = vmatpush.msrb.mxu0 %v695_v30 }
0x1223   :  { %v721_v36 = vpop.f32.mrf.mxu0 }
0x1224   :  { %v724_v37 = vadd.f32 %v721_v36, %v628_v35 }
0x1226   :  { %1302 = vtanh.f32 %v724_v37  ;;  %v1216_v39 = vmul.f32 -1.442695, %v724_v37 }
0x1228   :  { %1304 = vpow2.f32 %v1216_v39 }
0x122c   :  { %v1303_v38 = vpop.eup %1302 }
0x122d   :  { %747 = vrot.lane.b32.xlu2 %v1303_v38, %s1366_s26 }
0x122e   :  { %v1305_v40 = vpop.eup %1304 }
0x122f   :  { %v728_v41 = vadd.f32 1.0, %v1305_v40 }
0x1231   :  { %1306 = vrcp.f32 %v728_v41  ;;  %v740_v47 = vand.u32 2147483648, %v728_v41  ;;  %vm734_vm3 = vweird.f32 %v728_v41  ;;  %v738_v48 = vand.u32 2147483647, %v728_v41 }
0x1233   :  { %v741_v50 = vor.u32 1.1754944e-38, %v740_v47  ;;  %vm739_vm6 = vcmp.eq.f32.partialorder %v738_v48, 8.507059e+37 }
0x1237   :  { %v1307_v42 = vpop.eup %1306 }
0x1238   :  { %v730_v43 = vmul.f32 %v1307_v42, %v728_v41  ;;  %vm735_vm2 = vweird.f32 %v1307_v42 }
0x1239   :  { %vm736_vm5 = vmor %vm734_vm3, %vm735_vm2 }
0x123a   :  { %v731_v44 = vsub.f32 1.0, %v730_v43 }
0x123c   :  { %v732_v45 = vmul.f32 %v1307_v42, %v731_v44 }
0x123e   :  { %v733_v46 = vadd.f32 %v1307_v42, %v732_v45 }
0x1240   :  { %v737_v49 = vsel %vm736_vm5, %v1307_v42, %v733_v46 }
0x1241   :  { %v742_v52 = vsel %vm739_vm6, %v741_v50, %v737_v49 }
0x1242   :  { %v745_v54 = vmul.f32 %v742_v52, %v1519_v25 }
0x1287   :  { %v748_v51 = vpop.permute.xlu2 %747 }
0x1288   :  { %v750_v53 = vmul.f32 %v748_v51, %v742_v52 }
0x128a   :  { %752 = vrot.lane.b32.xlu0 %v750_v53, %s1366_s26 }
0x12fc   :  { %v753_v55 = vpop.permute.xlu0 %752 }
0x12fd   :  { %v755_v56 = vadd.f32 %v753_v55, %v745_v54  ;;  %v636_v54 = vpop.f32.mrf.mxu3 }
0x12fe   :  { %v637_v55 = vadd.f32 %v1514_v4, %v636_v54 }
0x12ff   :  { %1308 = vtanh.f32 %v755_v56 }
0x1305   :  { %v1309_v57 = vpop.eup %1308 }
0x1306   :  { %758 = vrot.lane.b32.xlu1 %v1309_v57, %s1366_s26 }
0x1378   :  { %v759_v59 = vpop.permute.xlu1 %758 }
0x1379   :  { %v761_v60 = vmul.f32 %v759_v59, %v742_v52 }
0x137b   :  { %764 = vrot.lane.b32.xlu2 %v761_v60, %s1367_s1 }
0x13d5   :  { %v765_v61 = vpop.permute.xlu2 %764 }
0x13d6   :  { %1217 = vmatmul.msk.f32.vlgmr.msra.gmra.mxu1 %vm68_vm4, %v765_v61 }
0x1453   :  { %v785_v0 = vpop.f32.mrf.mxu1 }
0x1454   :  { %v788_v1 = vadd.f32 %v785_v0, %v631_v63 }
0x1456   :  { %1310 = vtanh.f32 %v788_v1  ;;  %v1218_v5 = vmul.f32 -1.442695, %v788_v1 }
0x1458   :  { %1312 = vpow2.f32 %v1218_v5 }
0x145c   :  { %v1311_v2 = vpop.eup %1310 }
0x145d   :  { %811 = vrot.lane.b32.xlu0 %v1311_v2, %s1366_s26 }
0x145e   :  { %v1313_v6 = vpop.eup %1312 }
0x145f   :  { %v792_v7 = vadd.f32 1.0, %v1313_v6 }
0x1461   :  { %1314 = vrcp.f32 %v792_v7  ;;  %v804_v13 = vand.u32 2147483648, %v792_v7  ;;  %vm798_vm8 = vweird.f32 %v792_v7  ;;  %v802_v14 = vand.u32 2147483647, %v792_v7 }
0x1463   :  { %v805_v16 = vor.u32 1.1754944e-38, %v804_v13  ;;  %vm803_vm10 = vcmp.eq.f32.partialorder %v802_v14, 8.507059e+37 }
0x1467   :  { %v1315_v8 = vpop.eup %1314 }
0x1468   :  { %v794_v9 = vmul.f32 %v1315_v8, %v792_v7  ;;  %vm799_vm7 = vweird.f32 %v1315_v8 }
0x1469   :  { %vm800_vm9 = vmor %vm798_vm8, %vm799_vm7 }
0x146a   :  { %v795_v10 = vsub.f32 1.0, %v794_v9 }
0x146c   :  { %v796_v11 = vmul.f32 %v1315_v8, %v795_v10 }
0x146e   :  { %v797_v12 = vadd.f32 %v1315_v8, %v796_v11 }
0x1470   :  { %v801_v15 = vsel %vm800_vm9, %v1315_v8, %v797_v12 }
0x1471   :  { %v806_v18 = vsel %vm803_vm10, %v805_v16, %v801_v15 }
0x1472   :  { %v809_v20 = vmul.f32 %v806_v18, %v755_v56 }
0x14cf   :  { %v812_v17 = vpop.permute.xlu0 %811 }
0x14d0   :  { %v814_v19 = vmul.f32 %v812_v17, %v806_v18 }
0x14d2   :  { %816 = vrot.lane.b32.xlu1 %v814_v19, %s1366_s26 }
0x1544   :  { %v817_v21 = vpop.permute.xlu1 %816 }
0x1545   :  { %v819_v22 = vadd.f32 %v817_v21, %v809_v20  ;;  %v639_v20 = vpop.f32.mrf.mxu3 }
0x1546   :  { %v640_v21 = vadd.f32 %v1514_v4, %v639_v20 }
0x1547   :  { %1316 = vtanh.f32 %v819_v22 }
0x154d   :  { %v1317_v23 = vpop.eup %1316 }
0x154e   :  { %822 = vrot.lane.b32.xlu2 %v1317_v23, %s1366_s26 }
0x15a8   :  { %v823_v24 = vpop.permute.xlu2 %822 }
0x15a9   :  { %v825_v25 = vmul.f32 %v823_v24, %v806_v18 }
0x15ab   :  { %828 = vrot.lane.b32.xlu0 %v825_v25, %s1367_s1 }
0x161d   :  { %v829_v26 = vpop.permute.xlu0 %828 }
0x161e   :  { %1219 = vmatmul.msk.f32.vlgmr.msra.gmra.mxu2 %vm68_vm4, %v829_v26 }
0x16a1   :  { %v849_v29 = vpop.f32.mrf.mxu2 }
0x16a2   :  { %v852_v30 = vadd.f32 %v849_v29, %v634_v28 }
0x16a4   :  { %1318 = vtanh.f32 %v852_v30  ;;  %v1220_v32 = vmul.f32 -1.442695, %v852_v30 }
0x16a6   :  { %1320 = vpow2.f32 %v1220_v32 }
0x16aa   :  { %v1319_v31 = vpop.eup %1318 }
0x16ab   :  { %875 = vrot.lane.b32.xlu1 %v1319_v31, %s1366_s26 }
0x16ac   :  { %v1321_v33 = vpop.eup %1320 }
0x16ad   :  { %v856_v34 = vadd.f32 1.0, %v1321_v33 }
0x16af   :  { %1322 = vrcp.f32 %v856_v34  ;;  %v868_v40 = vand.u32 2147483648, %v856_v34  ;;  %vm862_vm12 = vweird.f32 %v856_v34  ;;  %v866_v41 = vand.u32 2147483647, %v856_v34 }
0x16b1   :  { %v869_v43 = vor.u32 1.1754944e-38, %v868_v40  ;;  %vm867_vm14 = vcmp.eq.f32.partialorder %v866_v41, 8.507059e+37 }
0x16b5   :  { %v1323_v35 = vpop.eup %1322 }
0x16b6   :  { %v858_v36 = vmul.f32 %v1323_v35, %v856_v34  ;;  %vm863_vm11 = vweird.f32 %v1323_v35 }
0x16b7   :  { %vm864_vm13 = vmor %vm862_vm12, %vm863_vm11 }
0x16b8   :  { %v859_v37 = vsub.f32 1.0, %v858_v36 }
0x16ba   :  { %v860_v38 = vmul.f32 %v1323_v35, %v859_v37 }
0x16bc   :  { %v861_v39 = vadd.f32 %v1323_v35, %v860_v38 }
0x16be   :  { %v865_v42 = vsel %vm864_vm13, %v1323_v35, %v861_v39  ;;  %v1203_v35 = vld [vmem:[%s1613_s0 + $0x38] sm:$0xff] }
0x16bf   :  { %v870_v45 = vsel %vm867_vm14, %v869_v43, %v865_v42  ;;  %v524_v38 = vadd.f32 %v1203_v35, %v1509_v3 }
0x16c0   :  { %v873_v47 = vmul.f32 %v870_v45, %v819_v22 }
0x171d   :  { %v876_v44 = vpop.permute.xlu1 %875 }
0x171e   :  { %v878_v46 = vmul.f32 %v876_v44, %v870_v45 }
0x1720   :  { %880 = vrot.lane.b32.xlu2 %v878_v46, %s1366_s26 }
0x177a   :  { %v881_v48 = vpop.permute.xlu2 %880 }
0x177b   :  { %v883_v49 = vadd.f32 %v881_v48, %v873_v47  ;;  %v1205_v47 = vmul.f32 -1.442695, %v524_v38 }
0x177d   :  { %1324 = vtanh.f32 %v883_v49 }
0x1783   :  { %v1325_v50 = vpop.eup %1324 }
0x1784   :  { %886 = vrot.lane.b32.xlu0 %v1325_v50, %s1366_s26 }
0x17f6   :  { %v887_v51 = vpop.permute.xlu0 %886 }
0x17f7   :  { %v889_v52 = vmul.f32 %v887_v51, %v870_v45 }
0x17f9   :  { %892 = vrot.lane.b32.xlu1 %v889_v52, %s1367_s1 }
0x186b   :  { %v893_v53 = vpop.permute.xlu1 %892 }
0x186c   :  { %1221 = vmatmul.msk.f32.vlgmr.msra.gmra.mxu0 %vm68_vm4, %v893_v53 }
0x18e9   :  { %v913_v56 = vpop.f32.mrf.mxu0 }
0x18ea   :  { %v916_v57 = vadd.f32 %v913_v56, %v637_v55 }
0x18ec   :  { %1326 = vtanh.f32 %v916_v57  ;;  %v1222_v60 = vmul.f32 -1.442695, %v916_v57 }
0x18ee   :  { %1328 = vpow2.f32 %v1222_v60 }
0x18f2   :  { %v1327_v59 = vpop.eup %1326 }
0x18f3   :  { %939 = vrot.lane.b32.xlu2 %v1327_v59, %s1366_s26 }
0x18f4   :  { %v1329_v61 = vpop.eup %1328 }
0x18f5   :  { %v920_v62 = vadd.f32 1.0, %v1329_v61 }
0x18f7   :  { %1330 = vrcp.f32 %v920_v62  ;;  %v932_v6 = vand.u32 2147483648, %v920_v62  ;;  %vm926_vm0 = vweird.f32 %v920_v62  ;;  %v930_v7 = vand.u32 2147483647, %v920_v62 }
0x18f9   :  { %v933_v9 = vor.u32 1.1754944e-38, %v932_v6  ;;  %vm931_vm2 = vcmp.eq.f32.partialorder %v930_v7, 8.507059e+37 }
0x18fd   :  { %v1331_v63 = vpop.eup %1330 }
0x18fe   :  { %v922_v0 = vmul.f32 %v1331_v63, %v920_v62  ;;  %vm927_vm15 = vweird.f32 %v1331_v63 }
0x18ff   :  { %vm928_vm1 = vmor %vm926_vm0, %vm927_vm15 }
0x1900   :  { %v923_v1 = vsub.f32 1.0, %v922_v0 }
0x1902   :  { %v924_v2 = vmul.f32 %v1331_v63, %v923_v1  ;;  %v642_v1 = vpop.f32.mrf.mxu3 }
0x1904   :  { %v925_v5 = vadd.f32 %v1331_v63, %v924_v2  ;;  %v643_v2 = vadd.f32 %v1514_v4, %v642_v1 }
0x1906   :  { %v929_v8 = vsel %vm928_vm1, %v1331_v63, %v925_v5 }
0x1907   :  { %v934_v11 = vsel %vm931_vm2, %v933_v9, %v929_v8 }
0x1908   :  { %v937_v13 = vmul.f32 %v934_v11, %v883_v49 }
0x194d   :  { %v940_v10 = vpop.permute.xlu2 %939 }
0x194e   :  { %v942_v12 = vmul.f32 %v940_v10, %v934_v11 }
0x1950   :  { %944 = vrot.lane.b32.xlu0 %v942_v12, %s1366_s26 }
0x19c2   :  { %v945_v14 = vpop.permute.xlu0 %944 }
0x19c3   :  { %v947_v15 = vadd.f32 %v945_v14, %v937_v13 }
0x19c5   :  { %1332 = vtanh.f32 %v947_v15 }
0x19cb   :  { %v1333_v16 = vpop.eup %1332 }
0x19cc   :  { %950 = vrot.lane.b32.xlu1 %v1333_v16, %s1366_s26 }
0x1a3e   :  { %v951_v17 = vpop.permute.xlu1 %950 }
0x1a3f   :  { %v953_v18 = vmul.f32 %v951_v17, %v934_v11 }
0x1a41   :  { %956 = vrot.lane.b32.xlu2 %v953_v18, %s1367_s1 }
0x1a9b   :  { %v957_v19 = vpop.permute.xlu2 %956 }
0x1a9c   :  { %1223 = vmatmul.msk.f32.vlgmr.msrb.gmra.mxu1 %vm68_vm4, %v957_v19 }
0x1b19   :  { %v977_v22 = vpop.f32.mrf.mxu1 }
0x1b1a   :  { %v980_v23 = vadd.f32 %v977_v22, %v640_v21 }
0x1b1c   :  { %1334 = vtanh.f32 %v980_v23  ;;  %v1224_v25 = vmul.f32 -1.442695, %v980_v23 }
0x1b1e   :  { %1336 = vpow2.f32 %v1224_v25 }
0x1b22   :  { %v1335_v24 = vpop.eup %1334 }
0x1b23   :  { %1003 = vrot.lane.b32.xlu0 %v1335_v24, %s1366_s26 }
0x1b24   :  { %v1337_v26 = vpop.eup %1336 }
0x1b25   :  { %v984_v27 = vadd.f32 1.0, %v1337_v26 }
0x1b27   :  { %1338 = vrcp.f32 %v984_v27  ;;  %v996_v33 = vand.u32 2147483648, %v984_v27  ;;  %vm990_vm5 = vweird.f32 %v984_v27  ;;  %v994_v34 = vand.u32 2147483647, %v984_v27 }
0x1b28   :  { %1340 = vtanh.f32 %v524_v38 }
0x1b29   :  { %v997_v37 = vor.u32 1.1754944e-38, %v996_v33  ;;  %vm995_vm7 = vcmp.eq.f32.partialorder %v994_v34, 8.507059e+37 }
0x1b2d   :  { %v1339_v28 = vpop.eup %1338 }
0x1b2e   :  { %v986_v29 = vmul.f32 %v1339_v28, %v984_v27  ;;  %vm991_vm3 = vweird.f32 %v1339_v28  ;;  %v1341_v42 = vpop.eup %1340 }
0x1b2f   :  { %vm992_vm6 = vmor %vm990_vm5, %vm991_vm3 }
0x1b30   :  { %v987_v30 = vsub.f32 1.0, %v986_v29 }
0x1b32   :  { %v988_v31 = vmul.f32 %v1339_v28, %v987_v30 }
0x1b34   :  { %v989_v32 = vadd.f32 %v1339_v28, %v988_v31 }
0x1b36   :  { %v993_v36 = vsel %vm992_vm6, %v1339_v28, %v989_v32 }
0x1b37   :  { %v998_v40 = vsel %vm995_vm7, %v997_v37, %v993_v36 }
0x1b38   :  { %v1001_v43 = vmul.f32 %v998_v40, %v947_v15 }
0x1b95   :  { %v1004_v39 = vpop.permute.xlu0 %1003 }
0x1b96   :  { %v1006_v41 = vmul.f32 %v1004_v39, %v998_v40 }
0x1b98   :  { %1008 = vrot.lane.b32.xlu1 %v1006_v41, %s1366_s26 }
0x1ba0   :  { %547 = vrot.lane.b32.xlu1 %v1341_v42, %s1366_s26 }
0x1c0a   :  { %v1009_v44 = vpop.permute.xlu1 %1008 }
0x1c0b   :  { %v1570_v45 = vadd.f32 %v1009_v44, %v1001_v43 }
0x1c0d   :  { %1342 = vtanh.f32 %v1570_v45 }
0x1c0e   :  { %1344 = vpow2.f32 %v1205_v47 }
0x1c12   :  { %v548_v61 = vpop.permute.xlu1 %547 }
0x1c13   :  { %v1343_v46 = vpop.eup %1342 }
0x1c14   :  { %1014 = vrot.lane.b32.xlu2 %v1343_v46, %s1366_s26  ;;  %v1345_v3 = vpop.eup %1344 }
0x1c15   :  { %v528_v48 = vadd.f32 1.0, %v1345_v3 }
0x1c17   :  { %1346 = vrcp.f32 %v528_v48  ;;  %v540_v56 = vand.u32 2147483648, %v528_v48  ;;  %vm534_vm9 = vweird.f32 %v528_v48  ;;  %v538_v57 = vand.u32 2147483647, %v528_v48 }
0x1c19   :  { %v541_v60 = vor.u32 1.1754944e-38, %v540_v56  ;;  %vm539_vm11 = vcmp.eq.f32.partialorder %v538_v57, 8.507059e+37 }
0x1c1d   :  { %v1347_v49 = vpop.eup %1346 }
0x1c1e   :  { %v530_v50 = vmul.f32 %v1347_v49, %v528_v48  ;;  %vm535_vm8 = vweird.f32 %v1347_v49 }
0x1c1f   :  { %vm536_vm10 = vmor %vm534_vm9, %vm535_vm8 }
0x1c20   :  { %v531_v51 = vsub.f32 1.0, %v530_v50 }
0x1c22   :  { %v532_v52 = vmul.f32 %v1347_v49, %v531_v51 }
0x1c24   :  { %v533_v54 = vadd.f32 %v1347_v49, %v532_v52 }
0x1c26   :  { %v537_v59 = vsel %vm536_vm10, %v1347_v49, %v533_v54 }
0x1c27   :  { %v542_v62 = vsel %vm539_vm11, %v541_v60, %v537_v59  ;;  %v1149_v60 = vld [vmem:[%s1618_s5 + $0x18] sm:$0xff] }
0x1c28   :  { %v550_v63 = vmul.f32 %v548_v61, %v542_v62  ;;  %v545_v8 = vmul.f32 %v542_v62, %v1498_v58  ;;  %v1148_v61 = vld [vmem:[%s1618_s5 + $0x10] sm:$0xff]  ;;  %1171 = vmatpush.msra.mxu1 %v1149_v60 }
0x1c2a   :  { %1172 = vmatpush.msra.mxu1 %v1148_v61 }
0x1c6e   :  { %v1015_v53 = vpop.permute.xlu2 %1014 }
0x1c6f   :  { %v1017_v55 = vmul.f32 %v1015_v53, %v998_v40 }
0x1c71   :  { %1020 = vrot.lane.b32.xlu0 %v1017_v55, %s1367_s1 }
0x1c79   :  { %552 = vrot.lane.b32.xlu0 %v550_v63, %s1366_s26  ;;  %v1146_v63 = vld [vmem:[%s1618_s5] sm:$0xff] }
0x1ce3   :  { %v1021_v0 = vpop.permute.xlu0 %1020 }
0x1ce4   :  { %1225 = vmatmul.msk.f32.vlgmr.msrb.gmra.mxu2 %vm68_vm4, %v1021_v0 }
0x1ceb   :  { %v553_v7 = vpop.permute.xlu0 %552 }
0x1cec   :  { %v555_v9 = vadd.f32 %v553_v7, %v545_v8 }
0x1d67   :  { %v1041_v5 = vpop.f32.mrf.mxu2 }
0x1d68   :  { %v1044_v6 = vadd.f32 %v1041_v5, %v643_v2  ;;  %v1237_v5 = vld [vmem:[%s1619_s6] ss:$0 sm:$0xff] }
0x1d6a   :  { %1348 = vtanh.f32 %v1044_v6  ;;  %v1226_v12 = vmul.f32 -1.442695, %v1044_v6 }
0x1d6b   :  { %1350 = vtanh.f32 %v555_v9 }
0x1d6c   :  { %1352 = vpow2.f32 %v1226_v12 }
0x1d70   :  { %v1349_v10 = vpop.eup %1348 }
0x1d71   :  { %1067 = vrot.lane.b32.xlu2 %v1349_v10, %s1366_s26  ;;  %v1351_v11 = vpop.eup %1350 }
0x1d72   :  { %v1353_v13 = vpop.eup %1352 }
0x1d73   :  { %v1048_v14 = vadd.f32 1.0, %v1353_v13 }
0x1d75   :  { %1354 = vrcp.f32 %v1048_v14  ;;  %v1060_v58 = vand.u32 2147483648, %v1048_v14  ;;  %vm1054_vm13 = vweird.f32 %v1048_v14  ;;  %v1058_v20 = vand.u32 2147483647, %v1048_v14 }
0x1d77   :  { %v1061_v22 = vor.u32 1.1754944e-38, %v1060_v58  ;;  %vm1059_vm15 = vcmp.eq.f32.partialorder %v1058_v20, 8.507059e+37 }
0x1d79   :  { %558 = vrot.lane.b32.xlu2 %v1351_v11, %s1366_s26 }
0x1d7b   :  { %v1355_v15 = vpop.eup %1354 }
0x1d7c   :  { %v1050_v16 = vmul.f32 %v1355_v15, %v1048_v14  ;;  %vm1055_vm12 = vweird.f32 %v1355_v15 }
0x1d7d   :  { %vm1056_vm14 = vmor %vm1054_vm13, %vm1055_vm12 }
0x1d7e   :  { %v1051_v17 = vsub.f32 1.0, %v1050_v16 }
0x1d80   :  { %v1052_v18 = vmul.f32 %v1355_v15, %v1051_v17 }
0x1d82   :  { %v1053_v19 = vadd.f32 %v1355_v15, %v1052_v18 }
0x1d84   :  { %v1057_v21 = vsel %vm1056_vm14, %v1355_v15, %v1053_v19 }
0x1d85   :  { %v1062_v24 = vsel %vm1059_vm15, %v1061_v22, %v1057_v21 }
0x1d86   :  { %v1065_v28 = vmul.f32 %v1062_v24, %v1570_v45 }
0x1dcb   :  { %v1068_v23 = vpop.permute.xlu2 %1067 }
0x1dcc   :  { %v1070_v25 = vmul.f32 %v1068_v23, %v1062_v24 }
0x1dce   :  { %1072 = vrot.lane.b32.xlu1 %v1070_v25, %s1366_s26 }
0x1dd3   :  { %v559_v26 = vpop.permute.xlu2 %558 }
0x1dd4   :  { %v561_v27 = vmul.f32 %v559_v26, %v542_v62  ;;  %v1147_v62 = vld [vmem:[%s1618_s5 + $0x8] sm:$0xff] }
0x1dd5   :  { %1173 = vmatpush.msra.mxu1 %v1147_v62 }
0x1dd6   :  { %563 = vrot.lane.b32.xlu1 %v561_v27, %s1367_s1 }
0x1dd7   :  { %1174 = vmatpush.msra.mxu1 %v1146_v63 }
0x1e40   :  { %v1073_v29 = vpop.permute.xlu1 %1072 }
0x1e41   :  { %v1075_v30 = vadd.f32 %v1073_v29, %v1065_v28 }
0x1e43   :  { %1356 = vtanh.f32 %v1075_v30 }
0x1e48   :  { %v564_v31 = vpop.permute.xlu1 %563 }
0x1e49   :  { %v1357_v32 = vpop.eup %1356  ;;  %566 = vst.msk [vmem:[#allocation2 + $0x38] sm:$0xff] %vm68_vm4, %v564_v31 }
0x1e4a   :  { %1078 = vrot.lane.b32.xlu0 %v1357_v32, %s1366_s26 }
0x1e50   :  { %v574_v33 = vld [vmem:[#allocation2 + $0x38] sm:$0xff] }
0x1e51   :  { %1213 = vmatmul.msk.f32.gmra.mxu3 %vm68_vm4, %v574_v33 }
0x1ebc   :  { %v1079_v34 = vpop.permute.xlu0 %1078 }
0x1ebd   :  { %v1081_v35 = vmul.f32 %v1079_v34, %v1062_v24 }
0x1ebf   :  { %1084 = vrot.lane.b32.xlu2 %v1081_v35, %s1367_s1 }
0x1ed4   :  { %v645_v37 = vpop.f32.mrf.mxu3 }
0x1ed5   :  { %v646_v38 = vadd.f32 %v1514_v4, %v645_v37 }
0x1f19   :  { %v1085_v36 = vpop.permute.xlu2 %1084 }
0x1f1a   :  { %1227 = vmatmul.msk.f32.vlgmr.msrb.gmra.mxu0 %vm68_vm4, %v1085_v36 }
0x1f97   :  { %v1105_v39 = vpop.f32.mrf.mxu0 }
0x1f98   :  { %v1108_v40 = vadd.f32 %v1105_v39, %v646_v38 }
0x1f9a   :  { %1358 = vtanh.f32 %v1108_v40  ;;  %v1228_v42 = vmul.f32 -1.442695, %v1108_v40 }
0x1f9c   :  { %1360 = vpow2.f32 %v1228_v42 }
0x1fa0   :  { %v1359_v41 = vpop.eup %1358 }
0x1fa1   :  { %1131 = vrot.lane.b32.xlu0 %v1359_v41, %s1366_s26 }
0x1fa2   :  { %v1361_v43 = vpop.eup %1360 }
0x1fa3   :  { %v1112_v44 = vadd.f32 1.0, %v1361_v43 }
0x1fa5   :  { %1362 = vrcp.f32 %v1112_v44  ;;  %v1124_v49 = vand.u32 2147483648, %v1112_v44  ;;  %vm1118_vm1 = vweird.f32 %v1112_v44  ;;  %v1122_v4 = vand.u32 2147483647, %v1112_v44 }
0x1fa7   :  { %v1125_v51 = vor.u32 1.1754944e-38, %v1124_v49  ;;  %vm1123_vm3 = vcmp.eq.f32.partialorder %v1122_v4, 8.507059e+37 }
0x1fab   :  { %v1363_v45 = vpop.eup %1362 }
0x1fac   :  { %v1114_v46 = vmul.f32 %v1363_v45, %v1112_v44  ;;  %vm1119_vm0 = vweird.f32 %v1363_v45 }
0x1fad   :  { %vm1120_vm2 = vmor %vm1118_vm1, %vm1119_vm0 }
0x1fae   :  { %v1115_v47 = vsub.f32 1.0, %v1114_v46 }
0x1fb0   :  { %v1116_v3 = vmul.f32 %v1363_v45, %v1115_v47 }
0x1fb2   :  { %v1117_v48 = vadd.f32 %v1363_v45, %v1116_v3 }
0x1fb4   :  { %v1121_v50 = vsel %vm1120_vm2, %v1363_v45, %v1117_v48 }
0x1fb5   :  { %v1126_v53 = vsel %vm1123_vm3, %v1125_v51, %v1121_v50 }
0x1fb6   :  { %v1129_v55 = vmul.f32 %v1126_v53, %v1075_v30 }
0x2013   :  { %v1132_v52 = vpop.permute.xlu0 %1131 }
0x2014   :  { %v1134_v54 = vmul.f32 %v1132_v52, %v1126_v53 }
0x2016   :  { %1136 = vrot.lane.b32.xlu1 %v1134_v54, %s1366_s26 }
0x2088   :  { %v1137_v56 = vpop.permute.xlu1 %1136 }
0x2089   :  { %v1139_v57 = vadd.f32 %v1137_v56, %v1129_v55 }
0x208b   :  { %1364 = vtanh.f32 %v1139_v57 }
0x2091   :  { %v1365_v59 = vpop.eup %1364 }
0x2092   :  { %1142 = vrot.lane.b32.xlu2 %v1365_v59, %s1366_s26 }
0x20ec   :  { %v1143_v0 = vpop.permute.xlu2 %1142 }
0x20ed   :  { %v1145_v1 = vmul.f32 %v1143_v0, %v1126_v53 }
0x20ef   :  { %1155 = vrot.lane.b32.xlu0 %v1145_v1, %s1367_s1 }
0x2161   :  { %v1156_v2 = vpop.permute.xlu0 %1155 }
0x2162   :  { %1229 = vmatmul.msk.f32.vlgmr.msra.gmra.mxu1 %vm68_vm4, %v1156_v2 }
0x21df   :  { %v1176_v6 = vpop.f32.mrf.mxu1 }
0x21e0   :  { %v1177_v7 = vadd.f32 %v1237_v5, %v1176_v6 }
0x21e2   :  { %1179 = vst [vmem:[%s1620_s7] sm:$0xff] %v1177_v7 }

</bundles_post_ra>
